<compile_context>
chip_gen: v7x
topology: tpu7x:2x2x1
jax: 0.10.0
libtpu: 0.0.40
codegen_flags: <defaults>
</compile_context>

<pallas_src>
import jax
import jax.numpy as jnp
from jax.experimental import pallas as pl
from jax.experimental.pallas import tpu as pltpu


# ---------------------------------------------------------------------------
# Kernel
# ---------------------------------------------------------------------------
def maf_kernel(ip_ref, x_ref, w1_ref, b12_ref, w2_ref, w3_ref, b3_ref,
               z_ref, ld_ref):
    """One batch tile: run all (dim-1) FCNNs + the flow transform, transposed.

    Shapes inside the kernel (TB = batch tile, lanes):
      x_ref   : (dim, TB)      f32
      w1_ref  : (L, H, dim)    bf16   (columns >= i zero-padded for layer i-1)
      b12_ref : (L, H, 2)      f32    (b1 | b2)
      w2_ref  : (L, H, H)      bf16
      w3_ref  : (L, 2, H)      bf16
      b3_ref  : (L, 2, 1)      f32
      ip_ref  : (1, 2)         f32 in SMEM  (initial_param: mu0, alpha0)
      z_ref   : (dim, TB)      f32 output   (already flipped along features)
      ld_ref  : (1, TB)        f32 output   (log_det)
    """
    dim = z_ref.shape[0]
    num_layers = w1_ref.shape[0]          # == dim - 1

    x = x_ref[...]                        # (dim, TB) f32
    x_bf = x.astype(jnp.bfloat16)

    # Feature 0: scalar (mu, alpha) from initial_param.
    mu0 = ip_ref[0, 0]
    alpha0 = ip_ref[0, 1]
    alpha0_row = jnp.zeros_like(x[0:1, :]) + alpha0              # (1, TB)
    rows = [None] * dim
    rows[dim - 1] = (x[0:1, :] - mu0) * jnp.exp(-alpha0_row)     # flipped slot for i=0
    log_det = -alpha0_row                                        # (1, TB)

    # Features 1..dim-1: one tiny FCNN each (static unroll; num_layers is small).
    for l in range(num_layers):
        i = l + 1
        w1 = w1_ref[l]                    # (H, dim) bf16, zero cols >= i
        w2 = w2_ref[l]                    # (H, H)  bf16
        w3 = w3_ref[l]                    # (2, H)  bf16
        b1 = b12_ref[l][:, 0:1]           # (H, 1)  f32
        b2 = b12_ref[l][:, 1:2]           # (H, 1)  f32
        b3 = b3_ref[l]                    # (2, 1)  f32

        h1 = jnp.tanh(
            jnp.dot(w1, x_bf, preferred_element_type=jnp.float32) + b1)
        h2 = jnp.tanh(
            jnp.dot(w2, h1.astype(jnp.bfloat16),
                    preferred_element_type=jnp.float32) + b2)
        out = jnp.dot(w3, h2.astype(jnp.bfloat16),
                      preferred_element_type=jnp.float32) + b3    # (2, TB)

        mu = out[0:1, :]
        alpha = out[1:2, :]
        rows[dim - 1 - i] = (x[i:i + 1, :] - mu) * jnp.exp(-alpha)
        log_det = log_det - alpha

    # Single lane-dense, full-tile store of the (already flipped) z^T block.
    z_ref[...] = jnp.concatenate(rows, axis=0)
    ld_ref[...] = log_det


# ---------------------------------------------------------------------------
# Wrapper
# ---------------------------------------------------------------------------
def maf_forward(x, packed_params, *, batch_tile=128):
    """MAF.forward(x, condition=None) -> (z flipped along features, log_det)."""
    w1s, b12s, w2s, w3s, b3s, initial_param = packed_params
    B, dim = x.shape
    L, H, _ = w1s.shape
    assert dim >= 2 and L == dim - 1
    assert batch_tile % 128 == 0, "batch tile must be lane-dense (multiple of 128)"

    tb = batch_tile
    B_pad = ((B + tb - 1) // tb) * tb
    xp = x if B_pad == B else jnp.pad(x, ((0, B_pad - B), (0, 0)))
    xT = xp.T.astype(jnp.float32)                       # (dim, B_pad) batch -> lanes
    ip = initial_param.reshape(1, 2).astype(jnp.float32)

    const3 = lambda b: (0, 0, 0)                        # resident weight stacks

    zT_flip, ld2d = pl.pallas_call(
        maf_kernel,
        out_shape=(
            jax.ShapeDtypeStruct((dim, B_pad), jnp.float32),
            jax.ShapeDtypeStruct((1, B_pad), jnp.float32),
        ),
        grid_spec=pl.GridSpec(
            grid=(B_pad // tb,),
            in_specs=[
                pl.BlockSpec((1, 2), lambda b: (0, 0),
                             memory_space=pltpu.MemorySpace.SMEM),  # initial_param
                pl.BlockSpec((dim, tb), lambda b: (0, b)),          # x^T tile
                pl.BlockSpec((L, H, dim), const3),                  # W1 stack (bf16)
                pl.BlockSpec((L, H, 2), const3),                    # b1|b2 stack
                pl.BlockSpec((L, H, H), const3),                    # W2 stack (bf16)
                pl.BlockSpec((L, 2, H), const3),                    # W3 stack (bf16)
                pl.BlockSpec((L, 2, 1), const3),                    # b3 stack
            ],
            out_specs=(
                pl.BlockSpec((dim, tb), lambda b: (0, b)),          # z^T (flipped)
                pl.BlockSpec((1, tb), lambda b: (0, b)),            # log_det
            ),
        ),
        compiler_params=pltpu.CompilerParams(
            dimension_semantics=("parallel",),
            vmem_limit_bytes=32 * 1024 * 1024,
        ),
    )(ip, xT, w1s, b12s, w2s, w3s, b3s)

    z = zT_flip.T[:B]            # (B, dim), already flipped along feature dim
    log_det = ld2d[0, :B]        # (B,)
    return z, log_det


# ---------------------------------------------------------------------------
# Parameter construction (PyTorch-style layout/init) and packing
# ---------------------------------------------------------------------------
def init_maf_params(key, dim, hidden_dim):
    """Per-layer params in PyTorch nn.Linear layout (out, in), f32."""
    def linear(k, fan_in, fan_out):
        kw, kb = jax.random.split(k)
        bound = 1.0 / (float(fan_in) ** 0.5)
        w = jax.random.uniform(kw, (fan_out, fan_in), jnp.float32, -bound, bound)
        b = jax.random.uniform(kb, (fan_out,), jnp.float32, -bound, bound)
        return w, b

    keys = jax.random.split(key, dim)
    layer_params = []
    for i in range(1, dim):
        k1, k2, k3 = jax.random.split(keys[i - 1], 3)
        w1, b1 = linear(k1, i, hidden_dim)            # Linear(i, H)
        w2, b2 = linear(k2, hidden_dim, hidden_dim)   # Linear(H, H)
        w3, b3 = linear(k3, hidden_dim, 2)            # Linear(H, 2)
        layer_params.append((w1, b1, w2, b2, w3, b3))
    bound0 = 0.5 ** 0.5
    initial_param = jax.random.uniform(keys[-1], (2,), jnp.float32, -bound0, bound0)
    return layer_params, initial_param


def pack_maf_params(layer_params, initial_param, dim):
    """Zero-pad / stack per-layer params for the fused kernel; weights -> bf16."""
    L = len(layer_params)
    w1s = jnp.stack(
        [jnp.pad(w1, ((0, 0), (0, dim - w1.shape[1])))
         for (w1, _, _, _, _, _) in layer_params]).astype(jnp.bfloat16)   # (L, H, dim)
    b12s = jnp.stack(
        [jnp.stack([b1, b2], axis=-1)
         for (_, b1, _, b2, _, _) in layer_params]).astype(jnp.float32)   # (L, H, 2)
    w2s = jnp.stack([w2 for (_, _, w2, _, _, _) in layer_params]).astype(jnp.bfloat16)  # (L, H, H)
    w3s = jnp.stack([w3 for (_, _, _, _, w3, _) in layer_params]).astype(jnp.bfloat16)  # (L, 2, H)
    b3s = jnp.stack([b3 for (_, _, _, _, _, b3) in layer_params]
                    ).reshape(L, 2, 1).astype(jnp.float32)                # (L, 2, 1)
    return (w1s, b12s, w2s, w3s, b3s, jnp.asarray(initial_param, jnp.float32))


# ---------------------------------------------------------------------------
# Pure-JAX reference (mirrors the PyTorch MAF.forward loop, full f32)
# ---------------------------------------------------------------------------
def maf_reference(x, layer_params, initial_param):
    B, dim = x.shape
    mu0, alpha0 = initial_param[0], initial_param[1]
    z = jnp.zeros_like(x)
    z = z.at[:, 0].set((x[:, 0] - mu0) / jnp.exp(alpha0))
    log_det = jnp.full((B,), -alpha0, x.dtype)
    for i in range(1, dim):
        w1, b1, w2, b2, w3, b3 = layer_params[i - 1]
        h1 = jnp.tanh(x[:, :i] @ w1.T + b1)
        h2 = jnp.tanh(h1 @ w2.T + b2)
        out = h2 @ w3.T + b3
        mu, alpha = out[:, 0], out[:, 1]
        z = z.at[:, i].set((x[:, i] - mu) / jnp.exp(alpha))
        log_det = log_det - alpha
    return z[:, ::-1], log_det


# ---------------------------------------------------------------------------
if __name__ == "__main__":
    dim, hidden_dim, batch = 8, 16, 256   # small, but lane-dense batch tiles

    key = jax.random.PRNGKey(0)
    kx, kp = jax.random.split(key)
    x = jax.random.normal(kx, (batch, dim), dtype=jnp.float32)

    layer_params, initial_param = init_maf_params(kp, dim, hidden_dim)
    packed = pack_maf_params(layer_params, initial_param, dim)

    fwd = jax.jit(lambda xx: maf_forward(xx, packed, batch_tile=128))
    z, log_det = fwd(x)
    z, log_det = jax.block_until_ready((z, log_det))

    z_ref, ld_ref = maf_reference(x, layer_params, initial_param)

    assert z.shape == (batch, dim)
    assert log_det.shape == (batch,)
    # bf16 matmul operands (f32 accumulation) -> ~1e-2-level relative agreement
    # with the pure-f32 reference.
    assert jnp.allclose(z, z_ref, atol=5e-2, rtol=5e-2), (
        "z mismatch: max abs err = %s" % jnp.max(jnp.abs(z - z_ref)))
    assert jnp.allclose(log_det, ld_ref, atol=5e-2, rtol=5e-2), (
        "log_det mismatch: max abs err = %s" % jnp.max(jnp.abs(log_det - ld_ref)))

    print("KERNEL_OK")
</pallas_src>

<mosaic_0001>
module attributes {stable_mosaic.version = 11 : i64} {
  func.func @maf_kernel(%arg0: i32, %arg1: memref<1x2xf32, #tpu.memory_space<smem>>, %arg2: memref<8x128xf32, #tpu.memory_space<vmem>>, %arg3: memref<7x16x8xbf16, #tpu.memory_space<vmem>>, %arg4: memref<7x16x2xf32, #tpu.memory_space<vmem>>, %arg5: memref<7x16x16xbf16, #tpu.memory_space<vmem>>, %arg6: memref<7x2x16xbf16, #tpu.memory_space<vmem>>, %arg7: memref<7x2x1xf32, #tpu.memory_space<vmem>>, %arg8: memref<8x128xf32, #tpu.memory_space<vmem>>, %arg9: memref<1x128xf32, #tpu.memory_space<vmem>>) attributes {dimension_semantics = [#tpu.dimension_semantics<parallel>], iteration_bounds = array<i64: 2>, scalar_prefetch = 0 : i64, scratch_operands = 0 : i64, tpu.core_type = #tpu.core_type<tc>, window_params = [{transform_indices = @transform_0, window_bounds = array<i64: 1, 2>}, {transform_indices = @transform_1, window_bounds = array<i64: 8, 128>}, {pipeline_mode = #tpu.pipeline_mode<synchronous>, transform_indices = @transform_2, window_bounds = array<i64: 7, 16, 8>}, {pipeline_mode = #tpu.pipeline_mode<synchronous>, transform_indices = @transform_3, window_bounds = array<i64: 7, 16, 2>}, {pipeline_mode = #tpu.pipeline_mode<synchronous>, transform_indices = @transform_4, window_bounds = array<i64: 7, 16, 16>}, {pipeline_mode = #tpu.pipeline_mode<synchronous>, transform_indices = @transform_5, window_bounds = array<i64: 7, 2, 16>}, {pipeline_mode = #tpu.pipeline_mode<synchronous>, transform_indices = @transform_6, window_bounds = array<i64: 7, 2, 1>}, {transform_indices = @transform_7, window_bounds = array<i64: 8, 128>}, {transform_indices = @transform_8, window_bounds = array<i64: 1, 128>}]} {
    %c0 = arith.constant 0 : index
    %c0_0 = arith.constant 0 : index
    %0 = vector.load %arg2[%c0, %c0_0] : memref<8x128xf32, #tpu.memory_space<vmem>>, vector<8x128xf32>
    %1 = arith.truncf %0 : vector<8x128xf32> to vector<8x128xbf16>
    %c0_1 = arith.constant 0 : index
    %c0_2 = arith.constant 0 : index
    %2 = memref.load %arg1[%c0_1, %c0_2] : memref<1x2xf32, #tpu.memory_space<smem>>
    %c0_3 = arith.constant 0 : index
    %c1 = arith.constant 1 : index
    %3 = memref.load %arg1[%c0_3, %c1] : memref<1x2xf32, #tpu.memory_space<smem>>
    %cst = arith.constant 0.000000e+00 : f32
    %4 = vector.broadcast %cst : f32 to vector<1x128xf32>
    %5 = vector.broadcast %3 : f32 to vector<1x128xf32>
    %6 = arith.addf %4, %5 : vector<1x128xf32>
    %7 = vector.extract_strided_slice %0 {offsets = [0, 0], sizes = [1, 128], strides = [1, 1]} : vector<8x128xf32> to vector<1x128xf32>
    %8 = vector.broadcast %2 : f32 to vector<1x128xf32>
    %9 = arith.subf %7, %8 : vector<1x128xf32>
    %cst_4 = arith.constant 0.000000e+00 : f32
    %10 = vector.broadcast %cst_4 : f32 to vector<1x128xf32>
    %11 = arith.subf %10, %6 : vector<1x128xf32>
    %12 = math.exp %11 : vector<1x128xf32>
    %13 = arith.mulf %9, %12 : vector<1x128xf32>
    %cst_5 = arith.constant 0.000000e+00 : f32
    %14 = vector.broadcast %cst_5 : f32 to vector<1x128xf32>
    %15 = arith.subf %14, %6 : vector<1x128xf32>
    %c0_6 = arith.constant 0 : index
    %c0_7 = arith.constant 0 : index
    %c0_8 = arith.constant 0 : index
    %16 = vector.load %arg3[%c0_6, %c0_7, %c0_8] : memref<7x16x8xbf16, #tpu.memory_space<vmem>>, vector<1x16x8xbf16>
    %17 = vector.shape_cast %16 : vector<1x16x8xbf16> to vector<16x8xbf16>
    %c0_9 = arith.constant 0 : index
    %c0_10 = arith.constant 0 : index
    %c0_11 = arith.constant 0 : index
    %18 = vector.load %arg5[%c0_9, %c0_10, %c0_11] : memref<7x16x16xbf16, #tpu.memory_space<vmem>>, vector<1x16x16xbf16>
    %19 = vector.shape_cast %18 : vector<1x16x16xbf16> to vector<16x16xbf16>
    %c0_12 = arith.constant 0 : index
    %c0_13 = arith.constant 0 : index
    %c0_14 = arith.constant 0 : index
    %20 = vector.load %arg6[%c0_12, %c0_13, %c0_14] : memref<7x2x16xbf16, #tpu.memory_space<vmem>>, vector<1x2x16xbf16>
    %21 = vector.shape_cast %20 : vector<1x2x16xbf16> to vector<2x16xbf16>
    %c0_15 = arith.constant 0 : index
    %c0_16 = arith.constant 0 : index
    %c0_17 = arith.constant 0 : index
    %22 = vector.load %arg4[%c0_15, %c0_16, %c0_17] : memref<7x16x2xf32, #tpu.memory_space<vmem>>, vector<1x16x2xf32>
    %23 = vector.shape_cast %22 : vector<1x16x2xf32> to vector<16x2xf32>
    %24 = vector.extract_strided_slice %23 {offsets = [0, 0], sizes = [16, 1], strides = [1, 1]} : vector<16x2xf32> to vector<16x1xf32>
    %c0_18 = arith.constant 0 : index
    %c0_19 = arith.constant 0 : index
    %c0_20 = arith.constant 0 : index
    %25 = vector.load %arg4[%c0_18, %c0_19, %c0_20] : memref<7x16x2xf32, #tpu.memory_space<vmem>>, vector<1x16x2xf32>
    %26 = vector.shape_cast %25 : vector<1x16x2xf32> to vector<16x2xf32>
    %27 = vector.extract_strided_slice %26 {offsets = [0, 1], sizes = [16, 1], strides = [1, 1]} : vector<16x2xf32> to vector<16x1xf32>
    %c0_21 = arith.constant 0 : index
    %c0_22 = arith.constant 0 : index
    %c0_23 = arith.constant 0 : index
    %28 = vector.load %arg7[%c0_21, %c0_22, %c0_23] : memref<7x2x1xf32, #tpu.memory_space<vmem>>, vector<1x2x1xf32>
    %29 = vector.shape_cast %28 : vector<1x2x1xf32> to vector<2x1xf32>
    %cst_24 = arith.constant dense<0.000000e+00> : vector<16x128xf32>
    %30 = tpu.matmul %17, %1, %cst_24 {dimension_numbers = #tpu.dot_dimension_numbers<[1], [0], [0], [1], [0, 0, 1, 1], [], []>} : vector<16x8xbf16>, vector<8x128xbf16>, vector<16x128xf32> -> vector<16x128xf32>
    %31 = vector.broadcast %24 : vector<16x1xf32> to vector<16x128xf32>
    %32 = arith.addf %30, %31 : vector<16x128xf32>
    %33 = math.tanh %32 : vector<16x128xf32>
    %34 = arith.truncf %33 : vector<16x128xf32> to vector<16x128xbf16>
    %cst_25 = arith.constant dense<0.000000e+00> : vector<16x128xf32>
    %35 = tpu.matmul %19, %34, %cst_25 {dimension_numbers = #tpu.dot_dimension_numbers<[1], [0], [0], [1], [0, 0, 1, 1], [], []>} : vector<16x16xbf16>, vector<16x128xbf16>, vector<16x128xf32> -> vector<16x128xf32>
    %36 = vector.broadcast %27 : vector<16x1xf32> to vector<16x128xf32>
    %37 = arith.addf %35, %36 : vector<16x128xf32>
    %38 = math.tanh %37 : vector<16x128xf32>
    %39 = arith.truncf %38 : vector<16x128xf32> to vector<16x128xbf16>
    %cst_26 = arith.constant dense<0.000000e+00> : vector<2x128xf32>
    %40 = tpu.matmul %21, %39, %cst_26 {dimension_numbers = #tpu.dot_dimension_numbers<[1], [0], [0], [1], [0, 0, 1, 1], [], []>} : vector<2x16xbf16>, vector<16x128xbf16>, vector<2x128xf32> -> vector<2x128xf32>
    %41 = vector.broadcast %29 : vector<2x1xf32> to vector<2x128xf32>
    %42 = arith.addf %40, %41 : vector<2x128xf32>
    %43 = vector.extract_strided_slice %42 {offsets = [0, 0], sizes = [1, 128], strides = [1, 1]} : vector<2x128xf32> to vector<1x128xf32>
    %44 = vector.extract_strided_slice %42 {offsets = [1, 0], sizes = [1, 128], strides = [1, 1]} : vector<2x128xf32> to vector<1x128xf32>
    %45 = vector.extract_strided_slice %0 {offsets = [1, 0], sizes = [1, 128], strides = [1, 1]} : vector<8x128xf32> to vector<1x128xf32>
    %46 = arith.subf %45, %43 : vector<1x128xf32>
    %cst_27 = arith.constant 0.000000e+00 : f32
    %47 = vector.broadcast %cst_27 : f32 to vector<1x128xf32>
    %48 = arith.subf %47, %44 : vector<1x128xf32>
    %49 = math.exp %48 : vector<1x128xf32>
    %50 = arith.mulf %46, %49 : vector<1x128xf32>
    %51 = arith.subf %15, %44 : vector<1x128xf32>
    %c1_28 = arith.constant 1 : index
    %c0_29 = arith.constant 0 : index
    %c0_30 = arith.constant 0 : index
    %52 = vector.load %arg3[%c1_28, %c0_29, %c0_30] : memref<7x16x8xbf16, #tpu.memory_space<vmem>>, vector<1x16x8xbf16>
    %53 = vector.shape_cast %52 : vector<1x16x8xbf16> to vector<16x8xbf16>
    %c1_31 = arith.constant 1 : index
    %c0_32 = arith.constant 0 : index
    %c0_33 = arith.constant 0 : index
    %54 = vector.load %arg5[%c1_31, %c0_32, %c0_33] : memref<7x16x16xbf16, #tpu.memory_space<vmem>>, vector<1x16x16xbf16>
    %55 = vector.shape_cast %54 : vector<1x16x16xbf16> to vector<16x16xbf16>
    %c1_34 = arith.constant 1 : index
    %c0_35 = arith.constant 0 : index
    %c0_36 = arith.constant 0 : index
    %56 = vector.load %arg6[%c1_34, %c0_35, %c0_36] : memref<7x2x16xbf16, #tpu.memory_space<vmem>>, vector<1x2x16xbf16>
    %57 = vector.shape_cast %56 : vector<1x2x16xbf16> to vector<2x16xbf16>
    %c1_37 = arith.constant 1 : index
    %c0_38 = arith.constant 0 : index
    %c0_39 = arith.constant 0 : index
    %58 = vector.load %arg4[%c1_37, %c0_38, %c0_39] : memref<7x16x2xf32, #tpu.memory_space<vmem>>, vector<1x16x2xf32>
    %59 = vector.shape_cast %58 : vector<1x16x2xf32> to vector<16x2xf32>
    %60 = vector.extract_strided_slice %59 {offsets = [0, 0], sizes = [16, 1], strides = [1, 1]} : vector<16x2xf32> to vector<16x1xf32>
    %c1_40 = arith.constant 1 : index
    %c0_41 = arith.constant 0 : index
    %c0_42 = arith.constant 0 : index
    %61 = vector.load %arg4[%c1_40, %c0_41, %c0_42] : memref<7x16x2xf32, #tpu.memory_space<vmem>>, vector<1x16x2xf32>
    %62 = vector.shape_cast %61 : vector<1x16x2xf32> to vector<16x2xf32>
    %63 = vector.extract_strided_slice %62 {offsets = [0, 1], sizes = [16, 1], strides = [1, 1]} : vector<16x2xf32> to vector<16x1xf32>
    %c1_43 = arith.constant 1 : index
    %c0_44 = arith.constant 0 : index
    %c0_45 = arith.constant 0 : index
    %64 = vector.load %arg7[%c1_43, %c0_44, %c0_45] : memref<7x2x1xf32, #tpu.memory_space<vmem>>, vector<1x2x1xf32>
    %65 = vector.shape_cast %64 : vector<1x2x1xf32> to vector<2x1xf32>
    %cst_46 = arith.constant dense<0.000000e+00> : vector<16x128xf32>
    %66 = tpu.matmul %53, %1, %cst_46 {dimension_numbers = #tpu.dot_dimension_numbers<[1], [0], [0], [1], [0, 0, 1, 1], [], []>} : vector<16x8xbf16>, vector<8x128xbf16>, vector<16x128xf32> -> vector<16x128xf32>
    %67 = vector.broadcast %60 : vector<16x1xf32> to vector<16x128xf32>
    %68 = arith.addf %66, %67 : vector<16x128xf32>
    %69 = math.tanh %68 : vector<16x128xf32>
    %70 = arith.truncf %69 : vector<16x128xf32> to vector<16x128xbf16>
    %cst_47 = arith.constant dense<0.000000e+00> : vector<16x128xf32>
    %71 = tpu.matmul %55, %70, %cst_47 {dimension_numbers = #tpu.dot_dimension_numbers<[1], [0], [0], [1], [0, 0, 1, 1], [], []>} : vector<16x16xbf16>, vector<16x128xbf16>, vector<16x128xf32> -> vector<16x128xf32>
    %72 = vector.broadcast %63 : vector<16x1xf32> to vector<16x128xf32>
    %73 = arith.addf %71, %72 : vector<16x128xf32>
    %74 = math.tanh %73 : vector<16x128xf32>
    %75 = arith.truncf %74 : vector<16x128xf32> to vector<16x128xbf16>
    %cst_48 = arith.constant dense<0.000000e+00> : vector<2x128xf32>
    %76 = tpu.matmul %57, %75, %cst_48 {dimension_numbers = #tpu.dot_dimension_numbers<[1], [0], [0], [1], [0, 0, 1, 1], [], []>} : vector<2x16xbf16>, vector<16x128xbf16>, vector<2x128xf32> -> vector<2x128xf32>
    %77 = vector.broadcast %65 : vector<2x1xf32> to vector<2x128xf32>
    %78 = arith.addf %76, %77 : vector<2x128xf32>
    %79 = vector.extract_strided_slice %78 {offsets = [0, 0], sizes = [1, 128], strides = [1, 1]} : vector<2x128xf32> to vector<1x128xf32>
    %80 = vector.extract_strided_slice %78 {offsets = [1, 0], sizes = [1, 128], strides = [1, 1]} : vector<2x128xf32> to vector<1x128xf32>
    %81 = vector.extract_strided_slice %0 {offsets = [2, 0], sizes = [1, 128], strides = [1, 1]} : vector<8x128xf32> to vector<1x128xf32>
    %82 = arith.subf %81, %79 : vector<1x128xf32>
    %cst_49 = arith.constant 0.000000e+00 : f32
    %83 = vector.broadcast %cst_49 : f32 to vector<1x128xf32>
    %84 = arith.subf %83, %80 : vector<1x128xf32>
    %85 = math.exp %84 : vector<1x128xf32>
    %86 = arith.mulf %82, %85 : vector<1x128xf32>
    %87 = arith.subf %51, %80 : vector<1x128xf32>
    %c2 = arith.constant 2 : index
    %c0_50 = arith.constant 0 : index
    %c0_51 = arith.constant 0 : index
    %88 = vector.load %arg3[%c2, %c0_50, %c0_51] : memref<7x16x8xbf16, #tpu.memory_space<vmem>>, vector<1x16x8xbf16>
    %89 = vector.shape_cast %88 : vector<1x16x8xbf16> to vector<16x8xbf16>
    %c2_52 = arith.constant 2 : index
    %c0_53 = arith.constant 0 : index
    %c0_54 = arith.constant 0 : index
    %90 = vector.load %arg5[%c2_52, %c0_53, %c0_54] : memref<7x16x16xbf16, #tpu.memory_space<vmem>>, vector<1x16x16xbf16>
    %91 = vector.shape_cast %90 : vector<1x16x16xbf16> to vector<16x16xbf16>
    %c2_55 = arith.constant 2 : index
    %c0_56 = arith.constant 0 : index
    %c0_57 = arith.constant 0 : index
    %92 = vector.load %arg6[%c2_55, %c0_56, %c0_57] : memref<7x2x16xbf16, #tpu.memory_space<vmem>>, vector<1x2x16xbf16>
    %93 = vector.shape_cast %92 : vector<1x2x16xbf16> to vector<2x16xbf16>
    %c2_58 = arith.constant 2 : index
    %c0_59 = arith.constant 0 : index
    %c0_60 = arith.constant 0 : index
    %94 = vector.load %arg4[%c2_58, %c0_59, %c0_60] : memref<7x16x2xf32, #tpu.memory_space<vmem>>, vector<1x16x2xf32>
    %95 = vector.shape_cast %94 : vector<1x16x2xf32> to vector<16x2xf32>
    %96 = vector.extract_strided_slice %95 {offsets = [0, 0], sizes = [16, 1], strides = [1, 1]} : vector<16x2xf32> to vector<16x1xf32>
    %c2_61 = arith.constant 2 : index
    %c0_62 = arith.constant 0 : index
    %c0_63 = arith.constant 0 : index
    %97 = vector.load %arg4[%c2_61, %c0_62, %c0_63] : memref<7x16x2xf32, #tpu.memory_space<vmem>>, vector<1x16x2xf32>
    %98 = vector.shape_cast %97 : vector<1x16x2xf32> to vector<16x2xf32>
    %99 = vector.extract_strided_slice %98 {offsets = [0, 1], sizes = [16, 1], strides = [1, 1]} : vector<16x2xf32> to vector<16x1xf32>
    %c2_64 = arith.constant 2 : index
    %c0_65 = arith.constant 0 : index
    %c0_66 = arith.constant 0 : index
    %100 = vector.load %arg7[%c2_64, %c0_65, %c0_66] : memref<7x2x1xf32, #tpu.memory_space<vmem>>, vector<1x2x1xf32>
    %101 = vector.shape_cast %100 : vector<1x2x1xf32> to vector<2x1xf32>
    %cst_67 = arith.constant dense<0.000000e+00> : vector<16x128xf32>
    %102 = tpu.matmul %89, %1, %cst_67 {dimension_numbers = #tpu.dot_dimension_numbers<[1], [0], [0], [1], [0, 0, 1, 1], [], []>} : vector<16x8xbf16>, vector<8x128xbf16>, vector<16x128xf32> -> vector<16x128xf32>
    %103 = vector.broadcast %96 : vector<16x1xf32> to vector<16x128xf32>
    %104 = arith.addf %102, %103 : vector<16x128xf32>
    %105 = math.tanh %104 : vector<16x128xf32>
    %106 = arith.truncf %105 : vector<16x128xf32> to vector<16x128xbf16>
    %cst_68 = arith.constant dense<0.000000e+00> : vector<16x128xf32>
    %107 = tpu.matmul %91, %106, %cst_68 {dimension_numbers = #tpu.dot_dimension_numbers<[1], [0], [0], [1], [0, 0, 1, 1], [], []>} : vector<16x16xbf16>, vector<16x128xbf16>, vector<16x128xf32> -> vector<16x128xf32>
    %108 = vector.broadcast %99 : vector<16x1xf32> to vector<16x128xf32>
    %109 = arith.addf %107, %108 : vector<16x128xf32>
    %110 = math.tanh %109 : vector<16x128xf32>
    %111 = arith.truncf %110 : vector<16x128xf32> to vector<16x128xbf16>
    %cst_69 = arith.constant dense<0.000000e+00> : vector<2x128xf32>
    %112 = tpu.matmul %93, %111, %cst_69 {dimension_numbers = #tpu.dot_dimension_numbers<[1], [0], [0], [1], [0, 0, 1, 1], [], []>} : vector<2x16xbf16>, vector<16x128xbf16>, vector<2x128xf32> -> vector<2x128xf32>
    %113 = vector.broadcast %101 : vector<2x1xf32> to vector<2x128xf32>
    %114 = arith.addf %112, %113 : vector<2x128xf32>
    %115 = vector.extract_strided_slice %114 {offsets = [0, 0], sizes = [1, 128], strides = [1, 1]} : vector<2x128xf32> to vector<1x128xf32>
    %116 = vector.extract_strided_slice %114 {offsets = [1, 0], sizes = [1, 128], strides = [1, 1]} : vector<2x128xf32> to vector<1x128xf32>
    %117 = vector.extract_strided_slice %0 {offsets = [3, 0], sizes = [1, 128], strides = [1, 1]} : vector<8x128xf32> to vector<1x128xf32>
    %118 = arith.subf %117, %115 : vector<1x128xf32>
    %cst_70 = arith.constant 0.000000e+00 : f32
    %119 = vector.broadcast %cst_70 : f32 to vector<1x128xf32>
    %120 = arith.subf %119, %116 : vector<1x128xf32>
    %121 = math.exp %120 : vector<1x128xf32>
    %122 = arith.mulf %118, %121 : vector<1x128xf32>
    %123 = arith.subf %87, %116 : vector<1x128xf32>
    %c3 = arith.constant 3 : index
    %c0_71 = arith.constant 0 : index
    %c0_72 = arith.constant 0 : index
    %124 = vector.load %arg3[%c3, %c0_71, %c0_72] : memref<7x16x8xbf16, #tpu.memory_space<vmem>>, vector<1x16x8xbf16>
    %125 = vector.shape_cast %124 : vector<1x16x8xbf16> to vector<16x8xbf16>
    %c3_73 = arith.constant 3 : index
    %c0_74 = arith.constant 0 : index
    %c0_75 = arith.constant 0 : index
    %126 = vector.load %arg5[%c3_73, %c0_74, %c0_75] : memref<7x16x16xbf16, #tpu.memory_space<vmem>>, vector<1x16x16xbf16>
    %127 = vector.shape_cast %126 : vector<1x16x16xbf16> to vector<16x16xbf16>
    %c3_76 = arith.constant 3 : index
    %c0_77 = arith.constant 0 : index
    %c0_78 = arith.constant 0 : index
    %128 = vector.load %arg6[%c3_76, %c0_77, %c0_78] : memref<7x2x16xbf16, #tpu.memory_space<vmem>>, vector<1x2x16xbf16>
    %129 = vector.shape_cast %128 : vector<1x2x16xbf16> to vector<2x16xbf16>
    %c3_79 = arith.constant 3 : index
    %c0_80 = arith.constant 0 : index
    %c0_81 = arith.constant 0 : index
    %130 = vector.load %arg4[%c3_79, %c0_80, %c0_81] : memref<7x16x2xf32, #tpu.memory_space<vmem>>, vector<1x16x2xf32>
    %131 = vector.shape_cast %130 : vector<1x16x2xf32> to vector<16x2xf32>
    %132 = vector.extract_strided_slice %131 {offsets = [0, 0], sizes = [16, 1], strides = [1, 1]} : vector<16x2xf32> to vector<16x1xf32>
    %c3_82 = arith.constant 3 : index
    %c0_83 = arith.constant 0 : index
    %c0_84 = arith.constant 0 : index
    %133 = vector.load %arg4[%c3_82, %c0_83, %c0_84] : memref<7x16x2xf32, #tpu.memory_space<vmem>>, vector<1x16x2xf32>
    %134 = vector.shape_cast %133 : vector<1x16x2xf32> to vector<16x2xf32>
    %135 = vector.extract_strided_slice %134 {offsets = [0, 1], sizes = [16, 1], strides = [1, 1]} : vector<16x2xf32> to vector<16x1xf32>
    %c3_85 = arith.constant 3 : index
    %c0_86 = arith.constant 0 : index
    %c0_87 = arith.constant 0 : index
    %136 = vector.load %arg7[%c3_85, %c0_86, %c0_87] : memref<7x2x1xf32, #tpu.memory_space<vmem>>, vector<1x2x1xf32>
    %137 = vector.shape_cast %136 : vector<1x2x1xf32> to vector<2x1xf32>
    %cst_88 = arith.constant dense<0.000000e+00> : vector<16x128xf32>
    %138 = tpu.matmul %125, %1, %cst_88 {dimension_numbers = #tpu.dot_dimension_numbers<[1], [0], [0], [1], [0, 0, 1, 1], [], []>} : vector<16x8xbf16>, vector<8x128xbf16>, vector<16x128xf32> -> vector<16x128xf32>
    %139 = vector.broadcast %132 : vector<16x1xf32> to vector<16x128xf32>
    %140 = arith.addf %138, %139 : vector<16x128xf32>
    %141 = math.tanh %140 : vector<16x128xf32>
    %142 = arith.truncf %141 : vector<16x128xf32> to vector<16x128xbf16>
    %cst_89 = arith.constant dense<0.000000e+00> : vector<16x128xf32>
    %143 = tpu.matmul %127, %142, %cst_89 {dimension_numbers = #tpu.dot_dimension_numbers<[1], [0], [0], [1], [0, 0, 1, 1], [], []>} : vector<16x16xbf16>, vector<16x128xbf16>, vector<16x128xf32> -> vector<16x128xf32>
    %144 = vector.broadcast %135 : vector<16x1xf32> to vector<16x128xf32>
    %145 = arith.addf %143, %144 : vector<16x128xf32>
    %146 = math.tanh %145 : vector<16x128xf32>
    %147 = arith.truncf %146 : vector<16x128xf32> to vector<16x128xbf16>
    %cst_90 = arith.constant dense<0.000000e+00> : vector<2x128xf32>
    %148 = tpu.matmul %129, %147, %cst_90 {dimension_numbers = #tpu.dot_dimension_numbers<[1], [0], [0], [1], [0, 0, 1, 1], [], []>} : vector<2x16xbf16>, vector<16x128xbf16>, vector<2x128xf32> -> vector<2x128xf32>
    %149 = vector.broadcast %137 : vector<2x1xf32> to vector<2x128xf32>
    %150 = arith.addf %148, %149 : vector<2x128xf32>
    %151 = vector.extract_strided_slice %150 {offsets = [0, 0], sizes = [1, 128], strides = [1, 1]} : vector<2x128xf32> to vector<1x128xf32>
    %152 = vector.extract_strided_slice %150 {offsets = [1, 0], sizes = [1, 128], strides = [1, 1]} : vector<2x128xf32> to vector<1x128xf32>
    %153 = vector.extract_strided_slice %0 {offsets = [4, 0], sizes = [1, 128], strides = [1, 1]} : vector<8x128xf32> to vector<1x128xf32>
    %154 = arith.subf %153, %151 : vector<1x128xf32>
    %cst_91 = arith.constant 0.000000e+00 : f32
    %155 = vector.broadcast %cst_91 : f32 to vector<1x128xf32>
    %156 = arith.subf %155, %152 : vector<1x128xf32>
    %157 = math.exp %156 : vector<1x128xf32>
    %158 = arith.mulf %154, %157 : vector<1x128xf32>
    %159 = arith.subf %123, %152 : vector<1x128xf32>
    %c4 = arith.constant 4 : index
    %c0_92 = arith.constant 0 : index
    %c0_93 = arith.constant 0 : index
    %160 = vector.load %arg3[%c4, %c0_92, %c0_93] : memref<7x16x8xbf16, #tpu.memory_space<vmem>>, vector<1x16x8xbf16>
    %161 = vector.shape_cast %160 : vector<1x16x8xbf16> to vector<16x8xbf16>
    %c4_94 = arith.constant 4 : index
    %c0_95 = arith.constant 0 : index
    %c0_96 = arith.constant 0 : index
    %162 = vector.load %arg5[%c4_94, %c0_95, %c0_96] : memref<7x16x16xbf16, #tpu.memory_space<vmem>>, vector<1x16x16xbf16>
    %163 = vector.shape_cast %162 : vector<1x16x16xbf16> to vector<16x16xbf16>
    %c4_97 = arith.constant 4 : index
    %c0_98 = arith.constant 0 : index
    %c0_99 = arith.constant 0 : index
    %164 = vector.load %arg6[%c4_97, %c0_98, %c0_99] : memref<7x2x16xbf16, #tpu.memory_space<vmem>>, vector<1x2x16xbf16>
    %165 = vector.shape_cast %164 : vector<1x2x16xbf16> to vector<2x16xbf16>
    %c4_100 = arith.constant 4 : index
    %c0_101 = arith.constant 0 : index
    %c0_102 = arith.constant 0 : index
    %166 = vector.load %arg4[%c4_100, %c0_101, %c0_102] : memref<7x16x2xf32, #tpu.memory_space<vmem>>, vector<1x16x2xf32>
    %167 = vector.shape_cast %166 : vector<1x16x2xf32> to vector<16x2xf32>
    %168 = vector.extract_strided_slice %167 {offsets = [0, 0], sizes = [16, 1], strides = [1, 1]} : vector<16x2xf32> to vector<16x1xf32>
    %c4_103 = arith.constant 4 : index
    %c0_104 = arith.constant 0 : index
    %c0_105 = arith.constant 0 : index
    %169 = vector.load %arg4[%c4_103, %c0_104, %c0_105] : memref<7x16x2xf32, #tpu.memory_space<vmem>>, vector<1x16x2xf32>
    %170 = vector.shape_cast %169 : vector<1x16x2xf32> to vector<16x2xf32>
    %171 = vector.extract_strided_slice %170 {offsets = [0, 1], sizes = [16, 1], strides = [1, 1]} : vector<16x2xf32> to vector<16x1xf32>
    %c4_106 = arith.constant 4 : index
    %c0_107 = arith.constant 0 : index
    %c0_108 = arith.constant 0 : index
    %172 = vector.load %arg7[%c4_106, %c0_107, %c0_108] : memref<7x2x1xf32, #tpu.memory_space<vmem>>, vector<1x2x1xf32>
    %173 = vector.shape_cast %172 : vector<1x2x1xf32> to vector<2x1xf32>
    %cst_109 = arith.constant dense<0.000000e+00> : vector<16x128xf32>
    %174 = tpu.matmul %161, %1, %cst_109 {dimension_numbers = #tpu.dot_dimension_numbers<[1], [0], [0], [1], [0, 0, 1, 1], [], []>} : vector<16x8xbf16>, vector<8x128xbf16>, vector<16x128xf32> -> vector<16x128xf32>
    %175 = vector.broadcast %168 : vector<16x1xf32> to vector<16x128xf32>
    %176 = arith.addf %174, %175 : vector<16x128xf32>
    %177 = math.tanh %176 : vector<16x128xf32>
    %178 = arith.truncf %177 : vector<16x128xf32> to vector<16x128xbf16>
    %cst_110 = arith.constant dense<0.000000e+00> : vector<16x128xf32>
    %179 = tpu.matmul %163, %178, %cst_110 {dimension_numbers = #tpu.dot_dimension_numbers<[1], [0], [0], [1], [0, 0, 1, 1], [], []>} : vector<16x16xbf16>, vector<16x128xbf16>, vector<16x128xf32> -> vector<16x128xf32>
    %180 = vector.broadcast %171 : vector<16x1xf32> to vector<16x128xf32>
    %181 = arith.addf %179, %180 : vector<16x128xf32>
    %182 = math.tanh %181 : vector<16x128xf32>
    %183 = arith.truncf %182 : vector<16x128xf32> to vector<16x128xbf16>
    %cst_111 = arith.constant dense<0.000000e+00> : vector<2x128xf32>
    %184 = tpu.matmul %165, %183, %cst_111 {dimension_numbers = #tpu.dot_dimension_numbers<[1], [0], [0], [1], [0, 0, 1, 1], [], []>} : vector<2x16xbf16>, vector<16x128xbf16>, vector<2x128xf32> -> vector<2x128xf32>
    %185 = vector.broadcast %173 : vector<2x1xf32> to vector<2x128xf32>
    %186 = arith.addf %184, %185 : vector<2x128xf32>
    %187 = vector.extract_strided_slice %186 {offsets = [0, 0], sizes = [1, 128], strides = [1, 1]} : vector<2x128xf32> to vector<1x128xf32>
    %188 = vector.extract_strided_slice %186 {offsets = [1, 0], sizes = [1, 128], strides = [1, 1]} : vector<2x128xf32> to vector<1x128xf32>
    %189 = vector.extract_strided_slice %0 {offsets = [5, 0], sizes = [1, 128], strides = [1, 1]} : vector<8x128xf32> to vector<1x128xf32>
    %190 = arith.subf %189, %187 : vector<1x128xf32>
    %cst_112 = arith.constant 0.000000e+00 : f32
    %191 = vector.broadcast %cst_112 : f32 to vector<1x128xf32>
    %192 = arith.subf %191, %188 : vector<1x128xf32>
    %193 = math.exp %192 : vector<1x128xf32>
    %194 = arith.mulf %190, %193 : vector<1x128xf32>
    %195 = arith.subf %159, %188 : vector<1x128xf32>
    %c5 = arith.constant 5 : index
    %c0_113 = arith.constant 0 : index
    %c0_114 = arith.constant 0 : index
    %196 = vector.load %arg3[%c5, %c0_113, %c0_114] : memref<7x16x8xbf16, #tpu.memory_space<vmem>>, vector<1x16x8xbf16>
    %197 = vector.shape_cast %196 : vector<1x16x8xbf16> to vector<16x8xbf16>
    %c5_115 = arith.constant 5 : index
    %c0_116 = arith.constant 0 : index
    %c0_117 = arith.constant 0 : index
    %198 = vector.load %arg5[%c5_115, %c0_116, %c0_117] : memref<7x16x16xbf16, #tpu.memory_space<vmem>>, vector<1x16x16xbf16>
    %199 = vector.shape_cast %198 : vector<1x16x16xbf16> to vector<16x16xbf16>
    %c5_118 = arith.constant 5 : index
    %c0_119 = arith.constant 0 : index
    %c0_120 = arith.constant 0 : index
    %200 = vector.load %arg6[%c5_118, %c0_119, %c0_120] : memref<7x2x16xbf16, #tpu.memory_space<vmem>>, vector<1x2x16xbf16>
    %201 = vector.shape_cast %200 : vector<1x2x16xbf16> to vector<2x16xbf16>
    %c5_121 = arith.constant 5 : index
    %c0_122 = arith.constant 0 : index
    %c0_123 = arith.constant 0 : index
    %202 = vector.load %arg4[%c5_121, %c0_122, %c0_123] : memref<7x16x2xf32, #tpu.memory_space<vmem>>, vector<1x16x2xf32>
    %203 = vector.shape_cast %202 : vector<1x16x2xf32> to vector<16x2xf32>
    %204 = vector.extract_strided_slice %203 {offsets = [0, 0], sizes = [16, 1], strides = [1, 1]} : vector<16x2xf32> to vector<16x1xf32>
    %c5_124 = arith.constant 5 : index
    %c0_125 = arith.constant 0 : index
    %c0_126 = arith.constant 0 : index
    %205 = vector.load %arg4[%c5_124, %c0_125, %c0_126] : memref<7x16x2xf32, #tpu.memory_space<vmem>>, vector<1x16x2xf32>
    %206 = vector.shape_cast %205 : vector<1x16x2xf32> to vector<16x2xf32>
    %207 = vector.extract_strided_slice %206 {offsets = [0, 1], sizes = [16, 1], strides = [1, 1]} : vector<16x2xf32> to vector<16x1xf32>
    %c5_127 = arith.constant 5 : index
    %c0_128 = arith.constant 0 : index
    %c0_129 = arith.constant 0 : index
    %208 = vector.load %arg7[%c5_127, %c0_128, %c0_129] : memref<7x2x1xf32, #tpu.memory_space<vmem>>, vector<1x2x1xf32>
    %209 = vector.shape_cast %208 : vector<1x2x1xf32> to vector<2x1xf32>
    %cst_130 = arith.constant dense<0.000000e+00> : vector<16x128xf32>
    %210 = tpu.matmul %197, %1, %cst_130 {dimension_numbers = #tpu.dot_dimension_numbers<[1], [0], [0], [1], [0, 0, 1, 1], [], []>} : vector<16x8xbf16>, vector<8x128xbf16>, vector<16x128xf32> -> vector<16x128xf32>
    %211 = vector.broadcast %204 : vector<16x1xf32> to vector<16x128xf32>
    %212 = arith.addf %210, %211 : vector<16x128xf32>
    %213 = math.tanh %212 : vector<16x128xf32>
    %214 = arith.truncf %213 : vector<16x128xf32> to vector<16x128xbf16>
    %cst_131 = arith.constant dense<0.000000e+00> : vector<16x128xf32>
    %215 = tpu.matmul %199, %214, %cst_131 {dimension_numbers = #tpu.dot_dimension_numbers<[1], [0], [0], [1], [0, 0, 1, 1], [], []>} : vector<16x16xbf16>, vector<16x128xbf16>, vector<16x128xf32> -> vector<16x128xf32>
    %216 = vector.broadcast %207 : vector<16x1xf32> to vector<16x128xf32>
    %217 = arith.addf %215, %216 : vector<16x128xf32>
    %218 = math.tanh %217 : vector<16x128xf32>
    %219 = arith.truncf %218 : vector<16x128xf32> to vector<16x128xbf16>
    %cst_132 = arith.constant dense<0.000000e+00> : vector<2x128xf32>
    %220 = tpu.matmul %201, %219, %cst_132 {dimension_numbers = #tpu.dot_dimension_numbers<[1], [0], [0], [1], [0, 0, 1, 1], [], []>} : vector<2x16xbf16>, vector<16x128xbf16>, vector<2x128xf32> -> vector<2x128xf32>
    %221 = vector.broadcast %209 : vector<2x1xf32> to vector<2x128xf32>
    %222 = arith.addf %220, %221 : vector<2x128xf32>
    %223 = vector.extract_strided_slice %222 {offsets = [0, 0], sizes = [1, 128], strides = [1, 1]} : vector<2x128xf32> to vector<1x128xf32>
    %224 = vector.extract_strided_slice %222 {offsets = [1, 0], sizes = [1, 128], strides = [1, 1]} : vector<2x128xf32> to vector<1x128xf32>
    %225 = vector.extract_strided_slice %0 {offsets = [6, 0], sizes = [1, 128], strides = [1, 1]} : vector<8x128xf32> to vector<1x128xf32>
    %226 = arith.subf %225, %223 : vector<1x128xf32>
    %cst_133 = arith.constant 0.000000e+00 : f32
    %227 = vector.broadcast %cst_133 : f32 to vector<1x128xf32>
    %228 = arith.subf %227, %224 : vector<1x128xf32>
    %229 = math.exp %228 : vector<1x128xf32>
    %230 = arith.mulf %226, %229 : vector<1x128xf32>
    %231 = arith.subf %195, %224 : vector<1x128xf32>
    %c6 = arith.constant 6 : index
    %c0_134 = arith.constant 0 : index
    %c0_135 = arith.constant 0 : index
    %232 = vector.load %arg3[%c6, %c0_134, %c0_135] : memref<7x16x8xbf16, #tpu.memory_space<vmem>>, vector<1x16x8xbf16>
    %233 = vector.shape_cast %232 : vector<1x16x8xbf16> to vector<16x8xbf16>
    %c6_136 = arith.constant 6 : index
    %c0_137 = arith.constant 0 : index
    %c0_138 = arith.constant 0 : index
    %234 = vector.load %arg5[%c6_136, %c0_137, %c0_138] : memref<7x16x16xbf16, #tpu.memory_space<vmem>>, vector<1x16x16xbf16>
    %235 = vector.shape_cast %234 : vector<1x16x16xbf16> to vector<16x16xbf16>
    %c6_139 = arith.constant 6 : index
    %c0_140 = arith.constant 0 : index
    %c0_141 = arith.constant 0 : index
    %236 = vector.load %arg6[%c6_139, %c0_140, %c0_141] : memref<7x2x16xbf16, #tpu.memory_space<vmem>>, vector<1x2x16xbf16>
    %237 = vector.shape_cast %236 : vector<1x2x16xbf16> to vector<2x16xbf16>
    %c6_142 = arith.constant 6 : index
    %c0_143 = arith.constant 0 : index
    %c0_144 = arith.constant 0 : index
    %238 = vector.load %arg4[%c6_142, %c0_143, %c0_144] : memref<7x16x2xf32, #tpu.memory_space<vmem>>, vector<1x16x2xf32>
    %239 = vector.shape_cast %238 : vector<1x16x2xf32> to vector<16x2xf32>
    %240 = vector.extract_strided_slice %239 {offsets = [0, 0], sizes = [16, 1], strides = [1, 1]} : vector<16x2xf32> to vector<16x1xf32>
    %c6_145 = arith.constant 6 : index
    %c0_146 = arith.constant 0 : index
    %c0_147 = arith.constant 0 : index
    %241 = vector.load %arg4[%c6_145, %c0_146, %c0_147] : memref<7x16x2xf32, #tpu.memory_space<vmem>>, vector<1x16x2xf32>
    %242 = vector.shape_cast %241 : vector<1x16x2xf32> to vector<16x2xf32>
    %243 = vector.extract_strided_slice %242 {offsets = [0, 1], sizes = [16, 1], strides = [1, 1]} : vector<16x2xf32> to vector<16x1xf32>
    %c6_148 = arith.constant 6 : index
    %c0_149 = arith.constant 0 : index
    %c0_150 = arith.constant 0 : index
    %244 = vector.load %arg7[%c6_148, %c0_149, %c0_150] : memref<7x2x1xf32, #tpu.memory_space<vmem>>, vector<1x2x1xf32>
    %245 = vector.shape_cast %244 : vector<1x2x1xf32> to vector<2x1xf32>
    %cst_151 = arith.constant dense<0.000000e+00> : vector<16x128xf32>
    %246 = tpu.matmul %233, %1, %cst_151 {dimension_numbers = #tpu.dot_dimension_numbers<[1], [0], [0], [1], [0, 0, 1, 1], [], []>} : vector<16x8xbf16>, vector<8x128xbf16>, vector<16x128xf32> -> vector<16x128xf32>
    %247 = vector.broadcast %240 : vector<16x1xf32> to vector<16x128xf32>
    %248 = arith.addf %246, %247 : vector<16x128xf32>
    %249 = math.tanh %248 : vector<16x128xf32>
    %250 = arith.truncf %249 : vector<16x128xf32> to vector<16x128xbf16>
    %cst_152 = arith.constant dense<0.000000e+00> : vector<16x128xf32>
    %251 = tpu.matmul %235, %250, %cst_152 {dimension_numbers = #tpu.dot_dimension_numbers<[1], [0], [0], [1], [0, 0, 1, 1], [], []>} : vector<16x16xbf16>, vector<16x128xbf16>, vector<16x128xf32> -> vector<16x128xf32>
    %252 = vector.broadcast %243 : vector<16x1xf32> to vector<16x128xf32>
    %253 = arith.addf %251, %252 : vector<16x128xf32>
    %254 = math.tanh %253 : vector<16x128xf32>
    %255 = arith.truncf %254 : vector<16x128xf32> to vector<16x128xbf16>
    %cst_153 = arith.constant dense<0.000000e+00> : vector<2x128xf32>
    %256 = tpu.matmul %237, %255, %cst_153 {dimension_numbers = #tpu.dot_dimension_numbers<[1], [0], [0], [1], [0, 0, 1, 1], [], []>} : vector<2x16xbf16>, vector<16x128xbf16>, vector<2x128xf32> -> vector<2x128xf32>
    %257 = vector.broadcast %245 : vector<2x1xf32> to vector<2x128xf32>
    %258 = arith.addf %256, %257 : vector<2x128xf32>
    %259 = vector.extract_strided_slice %258 {offsets = [0, 0], sizes = [1, 128], strides = [1, 1]} : vector<2x128xf32> to vector<1x128xf32>
    %260 = vector.extract_strided_slice %258 {offsets = [1, 0], sizes = [1, 128], strides = [1, 1]} : vector<2x128xf32> to vector<1x128xf32>
    %261 = vector.extract_strided_slice %0 {offsets = [7, 0], sizes = [1, 128], strides = [1, 1]} : vector<8x128xf32> to vector<1x128xf32>
    %262 = arith.subf %261, %259 : vector<1x128xf32>
    %cst_154 = arith.constant 0.000000e+00 : f32
    %263 = vector.broadcast %cst_154 : f32 to vector<1x128xf32>
    %264 = arith.subf %263, %260 : vector<1x128xf32>
    %265 = math.exp %264 : vector<1x128xf32>
    %266 = arith.mulf %262, %265 : vector<1x128xf32>
    %267 = arith.subf %231, %260 : vector<1x128xf32>
    %268 = tpu.concatenate %266, %230, %194, %158, %122, %86, %50, %13 in 0 : vector<1x128xf32>, vector<1x128xf32>, vector<1x128xf32>, vector<1x128xf32>, vector<1x128xf32>, vector<1x128xf32>, vector<1x128xf32>, vector<1x128xf32> -> vector<8x128xf32>
    %c0_155 = arith.constant 0 : index
    %c0_156 = arith.constant 0 : index
    %269 = vector.load %arg8[%c0_155, %c0_156] : memref<8x128xf32, #tpu.memory_space<vmem>>, vector<8x128xf32>
    tpu.vector_store %arg8[%c0_155, %c0_156], %268 {strides = array<i32>} : memref<8x128xf32, #tpu.memory_space<vmem>>, vector<8x128xf32>,
    %c0_157 = arith.constant 0 : index
    %c0_158 = arith.constant 0 : index
    %270 = vector.load %arg9[%c0_157, %c0_158] : memref<1x128xf32, #tpu.memory_space<vmem>>, vector<1x128xf32>
    tpu.vector_store %arg9[%c0_157, %c0_158], %267 {strides = array<i32>} : memref<1x128xf32, #tpu.memory_space<vmem>>, vector<1x128xf32>,
    return
  }
  func.func @transform_0(%arg0: i32) -> (i32, i32) {
    %c0_i32 = arith.constant 0 : i32
    %c0_i32_0 = arith.constant 0 : i32
    %c0_i32_1 = arith.constant 0 : i32
    return %c0_i32, %c0_i32_0 : i32, i32
  }
  func.func @transform_1(%arg0: i32) -> (i32, i32) {
    %c0_i32 = arith.constant 0 : i32
    %c0_i32_0 = arith.constant 0 : i32
    return %c0_i32, %arg0 : i32, i32
  }
  func.func @transform_2(%arg0: i32) -> (i32, i32, i32) {
    %c0_i32 = arith.constant 0 : i32
    %c0_i32_0 = arith.constant 0 : i32
    %c0_i32_1 = arith.constant 0 : i32
    %c0_i32_2 = arith.constant 0 : i32
    return %c0_i32, %c0_i32_0, %c0_i32_1 : i32, i32, i32
  }
  func.func @transform_3(%arg0: i32) -> (i32, i32, i32) {
    %c0_i32 = arith.constant 0 : i32
    %c0_i32_0 = arith.constant 0 : i32
    %c0_i32_1 = arith.constant 0 : i32
    %c0_i32_2 = arith.constant 0 : i32
    return %c0_i32, %c0_i32_0, %c0_i32_1 : i32, i32, i32
  }
  func.func @transform_4(%arg0: i32) -> (i32, i32, i32) {
    %c0_i32 = arith.constant 0 : i32
    %c0_i32_0 = arith.constant 0 : i32
    %c0_i32_1 = arith.constant 0 : i32
    %c0_i32_2 = arith.constant 0 : i32
    return %c0_i32, %c0_i32_0, %c0_i32_1 : i32, i32, i32
  }
  func.func @transform_5(%arg0: i32) -> (i32, i32, i32) {
    %c0_i32 = arith.constant 0 : i32
    %c0_i32_0 = arith.constant 0 : i32
    %c0_i32_1 = arith.constant 0 : i32
    %c0_i32_2 = arith.constant 0 : i32
    return %c0_i32, %c0_i32_0, %c0_i32_1 : i32, i32, i32
  }
  func.func @transform_6(%arg0: i32) -> (i32, i32, i32) {
    %c0_i32 = arith.constant 0 : i32
    %c0_i32_0 = arith.constant 0 : i32
    %c0_i32_1 = arith.constant 0 : i32
    %c0_i32_2 = arith.constant 0 : i32
    return %c0_i32, %c0_i32_0, %c0_i32_1 : i32, i32, i32
  }
  func.func @transform_7(%arg0: i32) -> (i32, i32) {
    %c0_i32 = arith.constant 0 : i32
    %c0_i32_0 = arith.constant 0 : i32
    return %c0_i32, %arg0 : i32, i32
  }
  func.func @transform_8(%arg0: i32) -> (i32, i32) {
    %c0_i32 = arith.constant 0 : i32
    %c0_i32_0 = arith.constant 0 : i32
    return %c0_i32, %arg0 : i32, i32
  }
}

</mosaic_0001>

<bundles_post_ra>
// kernel: _lambda_.1
= control target key start
LH: loop header
LB: loop body
LE: loop exit
PB: predicated region body
PF: predicated region fallthrough
CT: control target
= control target key end

     0   :  { %s3315_s0 = inlined_call_operand.vmem [shape: f32[1,2], index: 0, kind: input, shape index: {}]   ;;  %s3316_s1 = inlined_call_operand.hbm [shape: f32[8,256], index: 1, kind: input, shape index: {}]   ;;  %s3317_s2 = inlined_call_operand.hbm [shape: bf16[7,16,8], index: 2, kind: input, shape index: {}]   ;;  %s3318_s3 = inlined_call_operand.hbm [shape: f32[7,16,2], index: 3, kind: input, shape index: {}]   ;;  %s3319_s4 = inlined_call_operand.hbm [shape: bf16[7,16,16], index: 4, kind: input, shape index: {}]   ;;  %s3320_s5 = inlined_call_operand.vmem [shape: bf16[7,2,16], index: 5, kind: input, shape index: {}]   ;;  %s3321_s6 = inlined_call_operand.vmem [shape: f32[7,2,1], index: 6, kind: input, shape index: {}]   ;;  %s3322_s7 = inlined_call_operand.hbm [shape: f32[8,256], index: 7, kind: output, shape index: {0}]   ;;  %s3323_s8 = inlined_call_operand.hbm [shape: f32[1,256], index: 8, kind: output, shape index: {1}]  }
   0x1   :  { %3329 = sst [smem:[#allocation21_spill]] %s3315_s0 }
   0x2   :  { %14 = vsyncpa [#allocation5], 0 }
   0x3   :  { %15 = vsyncpa [#allocation3], 0 }
   0x4   :  { %17 = vsyncpa [#allocation3 + $0x1], 0 }
   0x5   :  { %18 = vsyncpa [#allocation8], 0 }
   0x6   :  { %19 = vsyncpa [#allocation11], 0 }
   0x7   :  { %20 = vsyncpa [#allocation4], 0 }
   0x8   :  { %22 = vsyncpa [#allocation4 + $0x1], 0 }
   0x9   :  { %23 = vsyncpa [#allocation14], 0 }
   0xa   :  { %25 = vsyncpa [#allocation14 + $0x1], 0  ;;  %s2720_s27 = smov 0   ;;  %s2722_s28 = smov 0  }
   0xb   :  { %s2724_s29 = smov 0   ;;  %s2726_s30 = smov 0  }
   0xc LB: > { %s2660_s9 = smov [#allocation7]   ;;  %s2741_s11 = sadd.s32 4294967295, %s2658_s30   ;;  %s2658_s30 = sphi %s2726_s30, %s3355_s30   ;;  %s2654_s29 = sphi %s2724_s29, %s3354_s29   ;;  %s2650_s28 = sphi %s2722_s28, %s3353_s28   ;;  %s2646_s27 = sphi %s2720_s27, %s3352_s27  }
   0xd   : > { %s263_s10 = sshll.u32 %s2660_s9, 4  ;;  %p1975_p0 = scmp.ge.s32.totalorder %s2658_s30, 1  ;;  %s2746_s10 = int_to_ptr.vmem [resolvable:$true] %s263_s10 }
   0xe   : > { %p3326_p1 = scmp.eq.s32.totalorder %s2741_s11, 0  ;;  %p240_p2 = scmp.lt.s32.totalorder %s2658_s30, 3 }
   0xf   : > { %s3331_s0 = sld [smem:[#allocation21_spill]]  ;;  %s2661_s17 = smov [#allocation9]  }
  0x10   : > { %p2748_p3 = pnand %p1975_p0, %p240_p2  ;;  %s276_s18 = sshll.u32 %s2661_s17, 4  ;;  %s2766_s18 = int_to_ptr.vmem [resolvable:$true] %s276_s18 }
  0x11   : > { %s2419_s21 = scalar_lea.hbm %s3317_s2, 896 }
  0x12   : > { %s3330_s12 = scalar_select %p2748_p3, 1, 0 }
  0x13   : > { %p2233_p5 = pneg %p2748_p3  ;;  %p2420_p7 = scmp.ne.s32.totalorder %s3317_s2, %s2419_s21 }
  0x14   : > { %p2426_p11 = scmp.lt.u32.totalorder %s2419_s21, %s3317_s2 }
  0x15   : > { %s253_s15 = sshll.u32 %s3331_s0, 4  ;;  %p2762_p6 = pnand %p2233_p5, %p3326_p1  ;;  %s2758_s15 = int_to_ptr.vmem [resolvable:$true] %s253_s15 }
  0x17   : > { %p2776_p8 = pneg %p2762_p6 }
  0x19   : > { %p2422_p9 = pnand %p2776_p8, %p2420_p7 }
  0x1b   : > { %p2423_p10 = pneg %p2422_p9 }
  0x1d   : > { %p2428_p12 = pnand %p2426_p11, %p2423_p10 }
  0x1f   : > { %2431 = shalt.err (!%p2428_p12)
}
  0x20   : > { %s2432_s9 = scalar_lea.vmem %s2746_s10, 896  ;;  %p2440_p5 = scmp.lt.s32.totalorder %s2746_s10, %s2746_s10 }
  0x21   : > { %p2433_p13 = scmp.ne.s32.totalorder %s2746_s10, %s2432_s9  ;;  %p2441_p4 = scmp.lt.s32.totalorder %s2432_s9, %s2432_s9 }
  0x23   : > { %p2435_p0 = pnand %p2433_p13, %p2776_p8  ;;  %p2442_p7 = por %p2441_p4, %p2440_p5 }
  0x25   : > { %p2436_p2 = pneg %p2435_p0 }
  0x27   : > { %p2443_p9 = pnand %p2442_p7, %p2436_p2 }
  0x29   : > { %2446 = shalt.err (!%p2443_p9)
}
  0x2a   : > { %s3324_s13 = smov 64   ;;  %s3325_s14 = smov 4  }
  0x2b   : > { %2239 = dma.hbm_to_vmem [thread:$0]  (!%p2762_p6), %s3317_s2, 896, %s2746_s10, [#allocation8], %s3324_s13, %s3324_s13, %s3325_s14  }
  0x2c   : > { %s2447_s20 = scalar_lea.vmem %s2758_s15, 16  ;;  %p2455_p12 = scmp.lt.s32.totalorder %s2758_s15, %s2758_s15 }
  0x2d   : > { %p2448_p4 = scmp.ne.s32.totalorder %s2758_s15, %s2447_s20  ;;  %p2456_p13 = scmp.lt.s32.totalorder %s2447_s20, %s2447_s20 }
  0x2f   : > { %p2450_p10 = pnand %p2448_p4, %p2776_p8  ;;  %p2457_p0 = por %p2456_p13, %p2455_p12 }
  0x31   : > { %p2451_p11 = pneg %p2450_p10 }
  0x33   : > { %p2458_p2 = pnand %p2457_p0, %p2451_p11 }
  0x35   : > { %2461 = shalt.err (!%p2458_p2)
}
  0x36   : > { %s2664_s21 = smov [#allocation2]   ;;  %s2462_s10 = scalar_lea.hbm %s3318_s3, 1792 }
  0x37   : > { %2236 = dma.vmem_to_smem (!%p2762_p6), %s2758_s15, 16, %s2664_s21, [#allocation5]  }
  0x38   : > { %p2463_p5 = scmp.ne.s32.totalorder %s3318_s3, %s2462_s10  ;;  %p2469_p4 = scmp.lt.u32.totalorder %s2462_s10, %s3318_s3 }
  0x3a   : > { %p2465_p7 = pnand %p2463_p5, %p2776_p8 }
  0x3c   : > { %p2466_p9 = pneg %p2465_p7 }
  0x3e   : > { %p2471_p10 = pnand %p2469_p4, %p2466_p9 }
  0x40   : > { %2474 = shalt.err (!%p2471_p10)
}
  0x41   : > { %s2475_s15 = scalar_lea.vmem %s2766_s18, 1792  ;;  %p2483_p0 = scmp.lt.s32.totalorder %s2766_s18, %s2766_s18 }
  0x42   : > { %p2476_p11 = scmp.ne.s32.totalorder %s2766_s18, %s2475_s15  ;;  %p2484_p2 = scmp.lt.s32.totalorder %s2475_s15, %s2475_s15 }
  0x44   : > { %p2478_p12 = pnand %p2476_p11, %p2776_p8  ;;  %p2485_p5 = por %p2484_p2, %p2483_p0 }
  0x46   : > { %p2479_p13 = pneg %p2478_p12 }
  0x48   : > { %p2486_p7 = pnand %p2485_p5, %p2479_p13 }
  0x4a   : > { %2489 = shalt.err (!%p2486_p7)
}
  0x4b   : > { %s2665_s19 = smov 128   ;;  %s2666_s20 = smov 8  }
  0x4c   : > { %2242 = dma.hbm_to_vmem [thread:$0]  (!%p2762_p6), %s3318_s3, 1792, %s2766_s18, [#allocation8], %s2665_s19, %s2665_s19, %s2666_s20  }
  0x4d   : > { %s2667_s23 = smov [#allocation10]   ;;  %s2490_s9 = scalar_lea.hbm %s3319_s4, 896 }
  0x4e   : > { %s289_s10 = sshll.u32 %s2667_s23, 4  ;;  %p2491_p9 = scmp.ne.s32.totalorder %s3319_s4, %s2490_s9  ;;  %s290_s10 = int_to_ptr.vmem [resolvable:$true] %s289_s10 }
  0x4f   : > { %p2497_p11 = scmp.lt.u32.totalorder %s2490_s9, %s3319_s4 }
  0x50   : > { %p2493_p4 = pnand %p2491_p9, %p2776_p8 }
  0x52   : > { %p2494_p10 = pneg %p2493_p4 }
  0x54   : > { %p2499_p12 = pnand %p2497_p11, %p2494_p10 }
  0x56   : > { %2502 = shalt.err (!%p2499_p12)
}
  0x57   : > { %s2503_s18 = scalar_lea.vmem %s290_s10, 896  ;;  %p2511_p5 = scmp.lt.s32.totalorder %s290_s10, %s290_s10 }
  0x58   : > { %p2504_p13 = scmp.ne.s32.totalorder %s290_s10, %s2503_s18  ;;  %p2512_p7 = scmp.lt.s32.totalorder %s2503_s18, %s2503_s18 }
  0x5a   : > { %p2506_p0 = pnand %p2504_p13, %p2776_p8  ;;  %p2513_p1 = por %p2512_p7, %p2511_p5 }
  0x5c   : > { %p2507_p2 = pneg %p2506_p0 }
  0x5e   : > { %p2514_p3 = pnand %p2513_p1, %p2507_p2 }
  0x60   : > { %2517 = shalt.err (!%p2514_p3)
}
  0x61   : > { %s3334_s19 = smov 4   ;;  %s3335_s20 = smov 64  }
  0x62   : > { %2245 = dma.hbm_to_vmem [thread:$0]  (!%p2762_p6), %s3319_s4, 896, %s290_s10, [#allocation11], %s3335_s20, %s3335_s20, %s3334_s19  }
  0x63   : > { %s1974_s16 = sadd.s32 4294967294, %s2658_s30   ;;  %s2855_s24 = sadd.s32 1, %s2658_s30  }
  0x64   : > { %s56_s21 = ssub.s32 %s2658_s30, %s2855_s24  ;;  %s59_s22 = sadd.s32 1, %s2654_s29 }
  0x65   : > { %p57_p1 = scmp.eq.s32.totalorder %s56_s21, 0  ;;  %p66_p3 = scmp.ne.s32.totalorder %s2654_s29, %s2650_s28 }
  0x66   : > { %p67_p8 = scmp.eq.s32.totalorder %s2658_s30, 0  ;;  %p72_p9 = scmp.ne.s32.totalorder %s2650_s28, %s2646_s27 }
  0x67   : > { %s2866_s23 = scalar_select %p57_p1, %s2654_s29, %s59_s22  }
  0x68   : > { %p2868_p4 = por %p67_p8, %p66_p3  ;;  %p3337_p10 = scmp.eq.s32.totalorder %s2741_s11, 0 }
  0x69   : > { %p201_p11 = scmp.eq.s32.totalorder %s2741_s11, 1  ;;  %p207_p12 = scmp.eq.s32.totalorder %s1974_s16, 1 }
  0x6a   : > { %p2874_p6 = por %p3337_p10, %p72_p9  ;;  %p2261_p13 = scmp.lt.s32.totalorder %s2658_s30, 2 }
  0x6b   : > { %s309_s26 = sand.u32 1, %s2654_s29   ;;  %p2881_p0 = por %p201_p11, %p66_p3 }
  0x6c   : > { %p2885_p2 = por %p207_p12, %p72_p9  ;;  %s1981_s15 = sshll.u32 %s309_s26, 3 }
  0x6d   : > { %s3339_s9 = scalar_select %p2881_p0, 1, 0 }
  0x6e   : > { %s3340_s17 = scalar_select %p2885_p2, 1, 0 }
  0x6f   : > { %s1982_s18 = sshll.u32 %s2658_s30, 7  ;;  %s313_s14 = scalar_lea.vmem [#allocation6], %s1981_s15 }
  0x70   : > { %s2893_s13 = scalar_lea.hbm %s3316_s1, %s1982_s18  ;;  %s320_s16 = sshll.u32 %s313_s14, 4  ;;  %s2895_s16 = int_to_ptr.vmem [resolvable:$true] %s320_s16 }
  0x71   : > { %p2899_p5 = pnand %p2261_p13, %p2868_p4  ;;  %s310_s22 = scalar_lea.sflag [#allocation3], %s309_s26 }
  0x72   : > { %s2518_s0 = scalar_lea.hbm %s2893_s13, 128  ;;  %s2523_s19 = scalar_lea.hbm %s3316_s1, 256 }
  0x73   : > { %p2519_p7 = scmp.ne.s32.totalorder %s2893_s13, %s2518_s0  ;;  %p2520_p1 = pneg %p2899_p5 }
  0x74   : > { %p2524_p9 = scmp.lt.u32.totalorder %s2893_s13, %s3316_s1  ;;  %p2525_p4 = scmp.lt.u32.totalorder %s2523_s19, %s2518_s0 }
  0x75   : > { %p2521_p3 = pnand %p2520_p1, %p2519_p7  ;;  %p2527_p11 = scmp.lt.u32.totalorder %s2518_s0, %s2893_s13 }
  0x76   : > { %p2526_p10 = por %p2525_p4, %p2524_p9 }
  0x77   : > { %p2522_p8 = pneg %p2521_p3 }
  0x78   : > { %p2528_p12 = por %p2527_p11, %p2526_p10 }
  0x7a   : > { %p2529_p13 = pnand %p2528_p12, %p2522_p8 }
  0x7c   : > { %2532 = shalt.err (!%p2529_p13)
}
  0x7d   : > { %s2533_s26 = scalar_lea.vmem %s2895_s16, 128  ;;  %s2668_s14 = smov [#allocation6]  }
  0x7e   : > { %p2534_p7 = scmp.ne.s32.totalorder %s2895_s16, %s2533_s26  ;;  %s2538_s15 = sshll.u32 %s2668_s14, 4  ;;  %s2539_s15 = int_to_ptr.vmem [resolvable:$false] %s2538_s15 }
  0x7f   : > { %s2540_s18 = scalar_lea.vmem %s2539_s15, 256  ;;  %p2541_p0 = scmp.lt.s32.totalorder %s2895_s16, %s2539_s15 }
  0x80   : > { %p2536_p3 = pnand %p2534_p7, %p2520_p1  ;;  %p2542_p9 = scmp.lt.s32.totalorder %s2540_s18, %s2533_s26 }
  0x82   : > { %p2537_p2 = pneg %p2536_p3  ;;  %p2543_p4 = por %p2542_p9, %p2541_p0 }
  0x84   : > { %p2544_p10 = pnand %p2543_p4, %p2537_p2 }
  0x86   : > { %2547 = shalt.err (!%p2544_p10)
}
  0x87   : > { %2249 = dma.hbm_to_vmem [thread:$0]  (!%p2899_p5), %s2893_s13, 128, %s2895_s16, %s310_s22  }
  0x88   : > { %p3342_p8 = scmp.ne.s32.totalorder %s3330_s12, 0 }
  0x89   : > { %p3343_p1 = scmp.eq.s32.totalorder (!%p3342_p8), %s2741_s11, 0 }
  0x8a   : > { %329 = sbr.rel (%p3342_p8) target bundleno = 2337 (0x921), region = 48 }
  0x91   : > { %2621 = dma.done.wait (%p3343_p1), [#allocation5], 16   ;;  %p3344_p11 = pmov %p3343_p1 }
  0x92   : > { %s2935_s0 = sand.u32 1, %s2650_s28  }
  0x93   : > { %2623 = vsyncadd (%p3344_p11), [#allocation5], 4294967280  ;;  %s1985_s21 = sshll.u32 %s2935_s0, 3  ;;  %s336_s19 = scalar_lea.sflag [#allocation3], %s2935_s0 }
  0x94   : > { %s2941_s13 = scalar_lea.vmem [#allocation6], %s1985_s21 }
  0x95   : > { %2625 = dma.done.wait (%p2874_p6), %s336_s19, 128  }
  0x96   : > { %2627 = vsyncadd (%p2874_p6), %s336_s19, 4294967168  ;;  %p3345_p0 = pmov %p3343_p1 }
  0x98   : > { %2629 = dma.done.wait (%p3345_p0), [#allocation8], 2688   ;;  %p3346_p2 = pmov %p3345_p0 }
  0x99   : > { %p3347_p5 = pmov %p3345_p0 }
  0x9a   : > { %2631 = vsyncadd (%p3346_p2), [#allocation8], 4294964608 }
  0x9b   : > { %2633 = dma.done.wait (%p3347_p5), [#allocation11], 896   ;;  %p3348_p12 = pmov %p3345_p0 }
  0x9d   : > { %2635 = vsyncadd (%p3348_p12), [#allocation11], 4294966400 }
  0x9e   : > { %356 = sfence }
  0x9f   : > { %v2956_v0 = vld [vmem:[%s2941_s13] sm:$0xff]  ;;  %vm429_vm0 = vcmask 1043456   ;;  %v2669_v1 = vmov 0.0   ;;  %vm2670_vm1 = vmmov 0   ;;  %v2332_v4 = vld [vmem:[#allocation7] sm:$0xff]   ;;  %vm425_vm2 = vcmask 64512  }
  0xa0   : > { %2085 = vmatprep.subr.bf16.mxu0 %v2669_v1  ;;  %v391_v2 = vpack.c.bf16 %v2956_v0, %v2956_v0  ;;  %2087 = vmatprep.mubr.msk.bf16.mxu0 %vm2670_vm1, %v2669_v1  ;;  %v407_v3 = vld [vmem:[#allocation9] sm:$0xff]  ;;  %v2671_v5 = vmov 0   ;;  %v408_v7 = vld [vmem:[#allocation9 + $0x8] sm:$0xff]  ;;  %v604_v8 = vld [vmem:[#allocation9 + $0x10] sm:$0xff]  ;;  %v2672_v9 = vmov 1   ;;  %vm490_vm3 = vcmask 130048  }
  0xa1   : > { %2311 = vset.pattern.permute.xlu0 %v2671_v5  ;;  %2091 = vmatprep.subr.bf16.mxu1 %v2669_v1  ;;  %v605_v10 = vld [vmem:[#allocation9 + $0x18] sm:$0xff]  ;;  %v2333_v22 = vld [vmem:[#allocation10] sm:$0xff]   ;;  %v800_v24 = vld [vmem:[#allocation9 + $0x28] sm:$0xff]  ;;  %s1990_s14 = sld [smem:[#allocation2 + $0x1]]  ;;  %s388_s15 = scalar_lea.vmem [#allocation13], %s2935_s0 }
  0xa2   : > { %v2966_v6 = vsel %vm429_vm0, %v391_v2, 0  ;;  %412 = vperm.xlu0 %2311, %v407_v3   ;;  %2093 = vmatprep.mubr.msk.bf16.mxu1 %vm2670_vm1, %v2669_v1  ;;  %v2334_v23 = vld [vmem:[#allocation7 + $0x8] sm:$0xff]   ;;  %v799_v26 = vld [vmem:[#allocation9 + $0x20] sm:$0xff]  ;;  %v2992_v27 = vld [vmem:[#allocation9 + $0x48] sm:$0xff]  ;;  %s1835_s18 = sshll.u32 %s388_s15, 4  ;;  %s1810_s16 = scalar_lea.sflag [#allocation14], %s2935_s0  ;;  %s3226_s18 = int_to_ptr.vmem [resolvable:$true] %s1835_s18 }
  0xa3   : > { %2086 = vmatpush3.bf16.msra.mxu0 %v2966_v6  ;;  %2312 = vset.pattern.permute.xlu1 %v2672_v9  ;;  %v994_v25 = vld [vmem:[#allocation9 + $0x30] sm:$0xff]  ;;  %v2998_v29 = vld [vmem:[#allocation9 + $0x68] sm:$0xff]  ;;  %v2025_v30 = vld [vmem:[%s3321_s6 + $0xa] sm:$0x3]  ;;  %s2548_s22 = scalar_lea.vmem %s3226_s18, 16  ;;  %p3349_p13 = scmp.ne.s32.totalorder %s3339_s9, 0 }
  0xa4   : > { %2097 = vmatprep.subr.bf16.mxu0 %v2669_v1  ;;  %478 = vperm.xlu1 %2312, %v407_v3   ;;  %v1384_v28 = vld [vmem:[#allocation9 + $0x50] sm:$0xff]  ;;  %v2018_v31 = vld [vmem:[%s3321_s6 + $0x8] sm:$0x3]  ;;  %v2004_v32 = vld [vmem:[%s3321_s6 + $0x4] sm:$0x3]  ;;  %p2549_p6 = scmp.ne.s32.totalorder %s3226_s18, %s2548_s22  ;;  %s2673_s25 = smov [#allocation13]  }
  0xa5   : > { %v409_v33 = vld [vmem:[%s3321_s6] sm:$0x3]  ;;  %v1189_v60 = vld [vmem:[#allocation9 + $0x40] sm:$0xff]  ;;  %v2011_v2 = vld [vmem:[%s3321_s6 + $0x6] sm:$0x3]  ;;  %s2552_s20 = sshll.u32 %s2673_s25, 4  ;;  %s2553_s20 = int_to_ptr.vmem [resolvable:$false] %s2552_s20 }
  0xa6   : > { %2088 = vmatmul.mubr.msk.bf16.vlgmr.msra.gmra.mrb[0].mxu0 %vm425_vm2, %v2332_v4  ;;  %417 = vperm.xlu0 %2311, %v408_v7   ;;  %v406_v53 = vld [vmem:[%s3320_s5] sm:$0x1]  ;;  %v1579_v62 = vld [vmem:[#allocation9 + $0x60] sm:$0xff]  ;;  %v1997_v3 = vld [vmem:[%s3321_s6 + $0x2] sm:$0x3]  ;;  %p2550_p7 = pnand %p2549_p6, %p3349_p13  ;;  %s2554_s26 = scalar_lea.vmem %s2553_s20, 32 }
  0xa7   : > { %2099 = vmatprep.mubr.msk.bf16.mxu0 %vm2670_vm1, %v2669_v1  ;;  %v2335_v57 = vld [vmem:[#allocation10 + $0x8] sm:$0xff]   ;;  %v2032_v63 = vld [vmem:[%s3321_s6 + $0xc] sm:$0x3]  ;;  %p2555_p9 = scmp.lt.s32.totalorder %s3226_s18, %s2553_s20  ;;  %p2556_p4 = scmp.lt.s32.totalorder %s2554_s26, %s2548_s22 }
  0xa8   : > { %482 = vperm.xlu1 %2312, %v408_v7   ;;  %v2336_v58 = vld [vmem:[#allocation7 + $0x10] sm:$0xff]   ;;  %p2551_p3 = pneg %p2550_p7 }
  0xa9   : > { %v995_v59 = vld [vmem:[#allocation9 + $0x38] sm:$0xff]  ;;  %p2557_p10 = por %p2556_p4, %p2555_p9 }
  0xaa   : > { %610 = vperm.xlu0 %2311, %v604_v8   ;;  %v1385_v61 = vld [vmem:[#allocation9 + $0x58] sm:$0xff] }
  0xab   : > { %p2558_p8 = pnand %p2557_p10, %p2551_p3 }
  0xac   : > { %2313 = vset.pattern.permute.xlu1 %v2671_v5 }
  0xad   : > { %615 = vperm.xlu1 %2313, %v605_v10  }
  0xae   : > { %2314 = vset.pattern.permute.xlu0 %v2672_v9 }
  0xaf   : > { %671 = vperm.xlu0 %2314, %v604_v8  }
  0xb1   : > { %2315 = vset.pattern.permute.xlu1 %v2672_v9 }
  0xb2   : > { %675 = vperm.xlu1 %2315, %v605_v10  }
  0xb3   : > { %2317 = vset.pattern.permute.xlu0 %v2671_v5 }
  0xb4   : > { %810 = vperm.xlu0 %2317, %v800_v24  }
  0xb6   : > { %2316 = vset.pattern.permute.xlu1 %v2671_v5 }
  0xb7   : > { %805 = vperm.xlu1 %2316, %v799_v26  }
  0xb8   : > { %1000 = vperm.xlu0 %2317, %v994_v25  }
  0xbb   : > { %2318 = vset.pattern.permute.xlu1 %v2672_v9 }
  0xbc   : > { %2320 = vset.pattern.permute.xlu0 %v2672_v9  ;;  %866 = vperm.xlu1 %2318, %v799_v26  }
  0xbd   : > { %1061 = vperm.xlu0 %2320, %v994_v25  }
  0xc0   : > { %870 = vperm.xlu1 %2318, %v800_v24  }
  0xc1   : > { %2323 = vset.pattern.permute.xlu0 %v2671_v5 }
  0xc2   : > { %1200 = vperm.xlu0 %2323, %v2992_v27  }
  0xc4   : > { %2319 = vset.pattern.permute.xlu1 %v2671_v5 }
  0xc5   : > { %1005 = vperm.xlu1 %2319, %v995_v59  }
  0xc6   : > { %1390 = vperm.xlu0 %2323, %v1384_v28  }
  0xc9   : > { %2321 = vset.pattern.permute.xlu1 %v2672_v9 }
  0xca   : > { %2326 = vset.pattern.permute.xlu0 %v2672_v9  ;;  %1065 = vperm.xlu1 %2321, %v995_v59  }
  0xcb   : > { %1451 = vperm.xlu0 %2326, %v1384_v28   ;;  %v1996_v28 = vld [vmem:[%s3320_s5 + $0x1] sm:$0x1] }
  0xce   : > { %2322 = vset.pattern.permute.xlu1 %v2671_v5 }
  0xcf   : > { %2329 = vset.pattern.permute.xlu0 %v2671_v5  ;;  %1195 = vperm.xlu1 %2322, %v1189_v60  }
  0xd0   : > { %1590 = vperm.xlu0 %2329, %v2998_v29  }
  0xd3   : > { %2324 = vset.pattern.permute.xlu1 %v2672_v9 }
  0xd4   : > { %1512 = vperm.xlu0 %2329, %v2025_v30   ;;  %1256 = vperm.xlu1 %2324, %v1189_v60  }
  0xd8   : > { %1317 = vperm.xlu0 %2329, %v2018_v31   ;;  %1260 = vperm.xlu1 %2324, %v2992_v27  }
  0xdc   : > { %927 = vperm.xlu0 %2329, %v2004_v32   ;;  %2325 = vset.pattern.permute.xlu1 %v2671_v5  ;;  %v2337_v32 = vld [vmem:[#allocation10 + $0x10] sm:$0xff]  }
  0xdd   : > { %1395 = vperm.xlu1 %2325, %v1385_v61  }
  0xe0   : > { %540 = vperm.xlu0 %2329, %v409_v33   ;;  %v2338_v33 = vld [vmem:[#allocation7 + $0x18] sm:$0xff]  }
  0xe1   : > { %2327 = vset.pattern.permute.xlu1 %v2672_v9 }
  0xe2   : > { %1455 = vperm.xlu1 %2327, %v1385_v61  }
  0xe6   : > { %2328 = vset.pattern.permute.xlu1 %v2671_v5 }
  0xe7   : > { %1585 = vperm.xlu1 %2328, %v1579_v62  }
  0xeb   : > { %2330 = vset.pattern.permute.xlu1 %v2672_v9 }
  0xec   : > { %1646 = vperm.xlu1 %2330, %v1579_v62  }
  0xf0   : > { %1650 = vperm.xlu1 %2330, %v2998_v29  }
  0xf4   : > { %2331 = vset.pattern.permute.xlu1 %v2671_v5 }
  0xf5   : > { %1707 = vperm.xlu1 %2331, %v2032_v63  }
  0xf9   : > { %1122 = vperm.xlu1 %2331, %v2011_v2  }
  0xfd   : > { %732 = vperm.xlu1 %2331, %v1997_v3  }
 0x121   : > { %v413_v11 = vpop.permute.xlu0 %412 }
 0x123   : > { %v479_v34 = vpop.permute.xlu1 %478 }
 0x125   : > { %v418_v15 = vpop.permute.xlu0 %417 }
 0x127   : > { %v483_v38 = vpop.permute.xlu1 %482 }
 0x129   : > { %v611_v42 = vpop.permute.xlu0 %610 }
 0x12c   : > { %v616_v44 = vpop.permute.xlu1 %615 }
 0x12e   : > { %v672_v10 = vpop.permute.xlu0 %671 }
 0x179   : > { %v467_v12 = vpop.f32.mrb[0].mxu0 }
 0x17a   : > { %v468_v13 = vadd.f32 %v467_v12, %v413_v11  ;;  %v2089_v14 = vpop.f32.mrb[1].mxu0  ;;  %v676_v12 = vpop.permute.xlu1 %675 }
 0x17b   : > { %v470_v16 = vpop.f32.mrb[2].mxu0 }
 0x17c   : > { %v471_v17 = vadd.f32 %v470_v16, %v418_v15  ;;  %v2090_v18 = vpop.f32.mrb[3].mxu0  ;;  %2346 = vtanh.f32 %v468_v13 }
 0x17e   : > { %2348 = vtanh.f32 %v471_v17  ;;  %v806_v17 = vpop.permute.xlu1 %805 }
 0x186   : > { %v2347_v19 = vpop.eup %2346 }
 0x188   : > { %v2349_v20 = vpop.eup %2348 }
 0x189   : > { %v476_v21 = vpack.c.bf16 %v2349_v20, %v2347_v19 }
 0x18b   : > { %2092 = vmatpush3.bf16.msra.mxu1 %v476_v21  ;;  %v811_v21 = vpop.permute.xlu0 %810 }
 0x18c   : > { %2103 = vmatprep.subr.bf16.mxu1 %v2669_v1 }
 0x18e   : > { %2094 = vmatmul.mubr.msk.bf16.vlgmr.msra.gmra.mrb[0].mxu1 %vm490_vm3, %v2333_v22 }
 0x18f   : > { %2104 = vmatpush3.bf16.msra.mxu1 %v2966_v6  ;;  %2105 = vmatprep.mubr.msk.bf16.mxu1 %vm2670_vm1, %v2669_v1 }
 0x190   : > { %2115 = vmatprep.subr.bf16.mxu1 %v2669_v1 }
 0x196   : > { %2106 = vmatmul.mubr.msk.bf16.vlgmr.msra.gmra.mrb[4].mxu1 %vm425_vm2, %v2334_v23 }
 0x197   : > { %2117 = vmatprep.mubr.msk.bf16.mxu1 %vm2670_vm1, %v2669_v1 }
 0x261   : > { %v528_v35 = vpop.f32.mrb[0].mxu1 }
 0x262   : > { %v529_v36 = vadd.f32 %v528_v35, %v479_v34  ;;  %v2095_v37 = vpop.f32.mrb[1].mxu1  ;;  %v867_v34 = vpop.permute.xlu1 %866 }
 0x263   : > { %v531_v39 = vpop.f32.mrb[2].mxu1 }
 0x264   : > { %v532_v40 = vadd.f32 %v531_v39, %v483_v38  ;;  %v2096_v41 = vpop.f32.mrb[3].mxu1  ;;  %2350 = vtanh.f32 %v529_v36  ;;  %v1001_v39 = vpop.permute.xlu0 %1000 }
 0x266   : > { %2352 = vtanh.f32 %v532_v40  ;;  %v871_v35 = vpop.permute.xlu1 %870 }
 0x268   : > { %v3073_v41 = vpop.permute.xlu0 %1061 }
 0x269   : > { %v660_v43 = vpop.f32.mrb[4].mxu1 }
 0x26a   : > { %v661_v45 = vadd.f32 %v660_v43, %v611_v42  ;;  %v2107_v46 = vpop.f32.mrb[5].mxu1  ;;  %v1006_v36 = vpop.permute.xlu1 %1005 }
 0x26b   : > { %v663_v47 = vpop.f32.mrb[6].mxu1 }
 0x26c   : > { %v664_v48 = vadd.f32 %v663_v47, %v616_v44  ;;  %v2108_v49 = vpop.f32.mrb[7].mxu1  ;;  %2354 = vtanh.f32 %v661_v45  ;;  %v3077_v43 = vpop.permute.xlu0 %1200 }
 0x26e   : > { %2356 = vtanh.f32 %v664_v48  ;;  %v2351_v50 = vpop.eup %2350  ;;  %v3067_v37 = vpop.permute.xlu1 %1065 }
 0x270   : > { %v2353_v51 = vpop.eup %2352  ;;  %v3081_v45 = vpop.permute.xlu0 %1390 }
 0x271   : > { %v537_v52 = vpack.c.bf16 %v2353_v51, %v2351_v50 }
 0x272   : > { %v3069_v38 = vpop.permute.xlu1 %1195 }
 0x273   : > { %2098 = vmatpush3.bf16.msra.mxu0 %v537_v52 }
 0x274   : > { %2109 = vmatprep.subr.bf16.mxu0 %v2669_v1  ;;  %v3085_v47 = vpop.permute.xlu0 %1451 }
 0x276   : > { %2100 = vmatmul.mubr.msk.bf16.vlgmr.msra.gmra.mrb[4].mxu0 %vm490_vm3, %v406_v53  ;;  %v2355_v54 = vpop.eup %2354  ;;  %v3071_v40 = vpop.permute.xlu1 %1256 }
 0x277   : > { %2111 = vmatprep.mubr.msk.bf16.mxu0 %vm2670_vm1, %v2669_v1 }
 0x278   : > { %v2357_v55 = vpop.eup %2356  ;;  %v3089_v49 = vpop.permute.xlu0 %1590 }
 0x279   : > { %v669_v56 = vpack.c.bf16 %v2357_v55, %v2355_v54 }
 0x27a   : > { %v3075_v42 = vpop.permute.xlu1 %1260 }
 0x27b   : > { %2110 = vmatpush3.bf16.msra.mxu0 %v669_v56 }
 0x27c   : > { %2121 = vmatprep.subr.bf16.mxu0 %v2669_v1  ;;  %v3093_v51 = vpop.permute.xlu0 %1512 }
 0x27e   : > { %2112 = vmatmul.mubr.msk.bf16.vlgmr.msra.gmra.mrb[8].mxu0 %vm490_vm3, %v2335_v57  ;;  %v3079_v44 = vpop.permute.xlu1 %1395 }
 0x27f   : > { %2122 = vmatpush3.bf16.msra.mxu0 %v2966_v6  ;;  %2123 = vmatprep.mubr.msk.bf16.mxu0 %vm2670_vm1, %v2669_v1 }
 0x280   : > { %2133 = vmatprep.subr.bf16.mxu0 %v2669_v1  ;;  %v3097_v53 = vpop.permute.xlu0 %1317 }
 0x282   : > { %v3083_v46 = vpop.permute.xlu1 %1455 }
 0x284   : > { %v928_v55 = vpop.permute.xlu0 %927 }
 0x286   : > { %2124 = vmatmul.mubr.msk.bf16.vlgmr.msra.gmra.mrb[12].mxu0 %vm425_vm2, %v2336_v58  ;;  %v3087_v48 = vpop.permute.xlu1 %1585  ;;  %v394_v58 = vstv %s1990_s14  ;;  %s2040_s14 = sshll.u32 %s2741_s11, 4 }
 0x287   : > { %2135 = vmatprep.mubr.msk.bf16.mxu0 %vm2670_vm1, %v2669_v1  ;;  %v3103_v59 = vsub.f32 0.0, %v394_v58  ;;  %s3224_s10 = scalar_lea.hbm %s3323_s8, %s2040_s14 }
 0x288   : > { %v541_v57 = vpop.permute.xlu0 %540 }
 0x28a   : > { %v3091_v50 = vpop.permute.xlu1 %1646 }
 0x28e   : > { %v3095_v52 = vpop.permute.xlu1 %1650 }
 0x292   : > { %v3099_v54 = vpop.permute.xlu1 %1707 }
 0x296   : > { %v3101_v56 = vpop.permute.xlu1 %1122 }
 0x29a   : > { %v733_v61 = vpop.permute.xlu1 %732 }
 0x349   : > { %v3049_v4 = vpop.f32.mrb[4].mxu0 }
 0x34a   : > { %v2101_v7 = vpop.f32.mrb[5].mxu0  ;;  %v3106_v60 = vadd.f32 %v3049_v4, %v541_v57 }
 0x34b   : > { %v583_v8 = vpop.f32.mrb[6].mxu0 }
 0x34c   : > { %v2102_v9 = vpop.f32.mrb[7].mxu0  ;;  %v594_v63 = vsub.f32 %v3103_v59, %v3106_v60 }
 0x351   : > { %v720_v11 = vpop.f32.mrb[8].mxu0 }
 0x352   : > { %v721_v5 = vadd.f32 %v720_v11, %v672_v10  ;;  %v2113_v13 = vpop.f32.mrb[9].mxu0 }
 0x353   : > { %v723_v14 = vpop.f32.mrb[10].mxu0 }
 0x354   : > { %v724_v15 = vadd.f32 %v723_v14, %v676_v12  ;;  %v2114_v16 = vpop.f32.mrb[11].mxu0  ;;  %2358 = vtanh.f32 %v721_v5 }
 0x356   : > { %2360 = vtanh.f32 %v724_v15 }
 0x359   : > { %v855_v18 = vpop.f32.mrb[12].mxu0 }
 0x35a   : > { %v856_v19 = vadd.f32 %v855_v18, %v806_v17  ;;  %v2125_v20 = vpop.f32.mrb[13].mxu0 }
 0x35b   : > { %v858_v22 = vpop.f32.mrb[14].mxu0 }
 0x35c   : > { %v859_v23 = vadd.f32 %v858_v22, %v811_v21  ;;  %v2126_v24 = vpop.f32.mrb[15].mxu0  ;;  %2362 = vtanh.f32 %v856_v19 }
 0x35e   : > { %2364 = vtanh.f32 %v859_v23  ;;  %v2359_v25 = vpop.eup %2358  ;;  %v2003_v23 = vld [vmem:[%s3320_s5 + $0x2] sm:$0x1] }
 0x360   : > { %v2361_v26 = vpop.eup %2360 }
 0x361   : > { %v729_v27 = vpack.c.bf16 %v2361_v26, %v2359_v25 }
 0x363   : > { %2116 = vmatpush3.bf16.msra.mxu1 %v729_v27  ;;  %v2339_v27 = vld [vmem:[#allocation10 + $0x18] sm:$0xff]  }
 0x364   : > { %2127 = vmatprep.subr.bf16.mxu1 %v2669_v1 }
 0x366   : > { %2118 = vmatmul.mubr.msk.bf16.vlgmr.msra.gmra.mrb[8].mxu1 %vm490_vm3, %v1996_v28  ;;  %v2363_v29 = vpop.eup %2362  ;;  %v2340_v28 = vld [vmem:[#allocation7 + $0x20] sm:$0xff]  }
 0x367   : > { %2129 = vmatprep.mubr.msk.bf16.mxu1 %vm2670_vm1, %v2669_v1 }
 0x368   : > { %v2365_v30 = vpop.eup %2364 }
 0x369   : > { %v864_v31 = vpack.c.bf16 %v2365_v30, %v2363_v29 }
 0x36b   : > { %2128 = vmatpush3.bf16.msra.mxu1 %v864_v31 }
 0x36c   : > { %2139 = vmatprep.subr.bf16.mxu1 %v2669_v1 }
 0x36e   : > { %2130 = vmatmul.mubr.msk.bf16.vlgmr.msra.gmra.mrb[12].mxu1 %vm490_vm3, %v2337_v32 }
 0x36f   : > { %2140 = vmatpush3.bf16.msra.mxu1 %v2966_v6  ;;  %2141 = vmatprep.mubr.msk.bf16.mxu1 %vm2670_vm1, %v2669_v1 }
 0x370   : > { %2151 = vmatprep.subr.bf16.mxu1 %v2669_v1 }
 0x376   : > { %2142 = vmatmul.mubr.msk.bf16.vlgmr.msra.gmra.mrb[16].mxu1 %vm425_vm2, %v2338_v33 }
 0x377   : > { %2153 = vmatprep.mubr.msk.bf16.mxu1 %vm2670_vm1, %v2669_v1 }
 0x439   : > { %v772_v62 = vpop.f32.mrb[8].mxu1 }
 0x43a   : > { %v3110_v2 = vadd.f32 %v772_v62, %v733_v61  ;;  %v2119_v3 = vpop.f32.mrb[9].mxu1 }
 0x43b   : > { %v775_v7 = vpop.f32.mrb[10].mxu1 }
 0x43c   : > { %v3113_v8 = vsub.f32 %v594_v63, %v3110_v2  ;;  %v2120_v9 = vpop.f32.mrb[11].mxu1 }
 0x441   : > { %v915_v10 = vpop.f32.mrb[12].mxu1 }
 0x442   : > { %v916_v11 = vadd.f32 %v915_v10, %v867_v34  ;;  %v2131_v12 = vpop.f32.mrb[13].mxu1 }
 0x443   : > { %v918_v5 = vpop.f32.mrb[14].mxu1  ;;  %v2341_v12 = vld [vmem:[#allocation10 + $0x20] sm:$0xff]  }
 0x444   : > { %v919_v13 = vadd.f32 %v918_v5, %v871_v35  ;;  %v2132_v4 = vpop.f32.mrb[15].mxu1  ;;  %2366 = vtanh.f32 %v916_v11  ;;  %v2342_v5 = vld [vmem:[#allocation7 + $0x28] sm:$0xff]  }
 0x446   : > { %2368 = vtanh.f32 %v919_v13 }
 0x449   : > { %v1050_v14 = vpop.f32.mrb[16].mxu1 }
 0x44a   : > { %v1051_v15 = vadd.f32 %v1050_v14, %v1001_v39  ;;  %v2143_v16 = vpop.f32.mrb[17].mxu1 }
 0x44b   : > { %v1053_v17 = vpop.f32.mrb[18].mxu1 }
 0x44c   : > { %v1054_v18 = vadd.f32 %v1053_v17, %v1006_v36  ;;  %v2144_v19 = vpop.f32.mrb[19].mxu1  ;;  %2370 = vtanh.f32 %v1051_v15 }
 0x44e   : > { %2372 = vtanh.f32 %v1054_v18  ;;  %v2367_v20 = vpop.eup %2366 }
 0x450   : > { %v2369_v21 = vpop.eup %2368 }
 0x451   : > { %v924_v22 = vpack.c.bf16 %v2369_v21, %v2367_v20 }
 0x453   : > { %2134 = vmatpush3.bf16.msra.mxu0 %v924_v22 }
 0x454   : > { %2145 = vmatprep.subr.bf16.mxu0 %v2669_v1 }
 0x456   : > { %2136 = vmatmul.mubr.msk.bf16.vlgmr.msra.gmra.mrb[16].mxu0 %vm490_vm3, %v2003_v23  ;;  %v2371_v24 = vpop.eup %2370 }
 0x457   : > { %2147 = vmatprep.mubr.msk.bf16.mxu0 %vm2670_vm1, %v2669_v1 }
 0x458   : > { %v2373_v25 = vpop.eup %2372 }
 0x459   : > { %v1059_v26 = vpack.c.bf16 %v2373_v25, %v2371_v24 }
 0x45b   : > { %2146 = vmatpush3.bf16.msra.mxu0 %v1059_v26 }
 0x45c   : > { %2157 = vmatprep.subr.bf16.mxu0 %v2669_v1 }
 0x45e   : > { %2148 = vmatmul.mubr.msk.bf16.vlgmr.msra.gmra.mrb[20].mxu0 %vm490_vm3, %v2339_v27 }
 0x45f   : > { %2158 = vmatpush3.bf16.msra.mxu0 %v2966_v6  ;;  %2159 = vmatprep.mubr.msk.bf16.mxu0 %vm2670_vm1, %v2669_v1 }
 0x460   : > { %2169 = vmatprep.subr.bf16.mxu0 %v2669_v1 }
 0x466   : > { %2160 = vmatmul.mubr.msk.bf16.vlgmr.msra.gmra.mrb[24].mxu0 %vm425_vm2, %v2340_v28 }
 0x467   : > { %2171 = vmatprep.mubr.msk.bf16.mxu0 %vm2670_vm1, %v2669_v1 }
 0x529   : > { %v967_v29 = vpop.f32.mrb[16].mxu0 }
 0x52a   : > { %v3131_v30 = vadd.f32 %v967_v29, %v928_v55  ;;  %v2137_v31 = vpop.f32.mrb[17].mxu0 }
 0x52b   : > { %v970_v32 = vpop.f32.mrb[18].mxu0 }
 0x52c   : > { %v984_v33 = vsub.f32 %v3113_v8, %v3131_v30  ;;  %v2138_v34 = vpop.f32.mrb[19].mxu0 }
 0x52d   : > { %v2344_v34 = vld [vmem:[#allocation7 + $0x30] sm:$0xff]  }
 0x531   : > { %v1110_v35 = vpop.f32.mrb[20].mxu0 }
 0x532   : > { %v1111_v36 = vadd.f32 %v1110_v35, %v3073_v41  ;;  %v2149_v39 = vpop.f32.mrb[21].mxu0 }
 0x533   : > { %v1113_v57 = vpop.f32.mrb[22].mxu0 }
 0x534   : > { %v1114_v58 = vadd.f32 %v1113_v57, %v3067_v37  ;;  %v2150_v61 = vpop.f32.mrb[23].mxu0  ;;  %2374 = vtanh.f32 %v1111_v36  ;;  %v2010_v37 = vld [vmem:[%s3320_s5 + $0x3] sm:$0x1] }
 0x536   : > { %2376 = vtanh.f32 %v1114_v58 }
 0x539   : > { %v1245_v62 = vpop.f32.mrb[24].mxu0 }
 0x53a   : > { %v1246_v55 = vadd.f32 %v1245_v62, %v3069_v38  ;;  %v2161_v63 = vpop.f32.mrb[25].mxu0 }
 0x53b   : > { %v1248_v3 = vpop.f32.mrb[26].mxu0 }
 0x53c   : > { %v1249_v7 = vadd.f32 %v1248_v3, %v3077_v43  ;;  %v2162_v9 = vpop.f32.mrb[27].mxu0  ;;  %2378 = vtanh.f32 %v1246_v55 }
 0x53e   : > { %2380 = vtanh.f32 %v1249_v7  ;;  %v2375_v8 = vpop.eup %2374 }
 0x540   : > { %v2377_v10 = vpop.eup %2376 }
 0x541   : > { %v1119_v41 = vpack.c.bf16 %v2377_v10, %v2375_v8 }
 0x543   : > { %2152 = vmatpush3.bf16.msra.mxu1 %v1119_v41 }
 0x544   : > { %2163 = vmatprep.subr.bf16.mxu1 %v2669_v1 }
 0x546   : > { %2154 = vmatmul.mubr.msk.bf16.vlgmr.msra.gmra.mrb[20].mxu1 %vm490_vm3, %v2010_v37  ;;  %v2379_v38 = vpop.eup %2378 }
 0x547   : > { %2165 = vmatprep.mubr.msk.bf16.mxu1 %vm2670_vm1, %v2669_v1 }
 0x548   : > { %v2381_v43 = vpop.eup %2380 }
 0x549   : > { %v1254_v11 = vpack.c.bf16 %v2381_v43, %v2379_v38 }
 0x54b   : > { %2164 = vmatpush3.bf16.msra.mxu1 %v1254_v11 }
 0x54c   : > { %2175 = vmatprep.subr.bf16.mxu1 %v2669_v1 }
 0x54e   : > { %2166 = vmatmul.mubr.msk.bf16.vlgmr.msra.gmra.mrb[24].mxu1 %vm490_vm3, %v2341_v12  ;;  %v2345_v12 = vld [vmem:[#allocation10 + $0x30] sm:$0xff]  }
 0x54f   : > { %2176 = vmatpush3.bf16.msra.mxu1 %v2966_v6  ;;  %2177 = vmatprep.mubr.msk.bf16.mxu1 %vm2670_vm1, %v2669_v1 }
 0x550   : > { %2187 = vmatprep.subr.bf16.mxu1 %v2669_v1 }
 0x556   : > { %2178 = vmatmul.mubr.msk.bf16.vlgmr.msra.gmra.mrb[28].mxu1 %vm425_vm2, %v2342_v5 }
 0x557   : > { %2189 = vmatprep.mubr.msk.bf16.mxu1 %vm2670_vm1, %v2669_v1 }
 0x619   : > { %v1162_v13 = vpop.f32.mrb[20].mxu1 }
 0x61a   : > { %v3156_v4 = vadd.f32 %v1162_v13, %v3101_v56  ;;  %v2155_v14 = vpop.f32.mrb[21].mxu1 }
 0x61b   : > { %v1165_v15 = vpop.f32.mrb[22].mxu1 }
 0x61c   : > { %v3159_v16 = vsub.f32 %v984_v33, %v3156_v4  ;;  %v2156_v17 = vpop.f32.mrb[23].mxu1  ;;  %v2343_v33 = vld [vmem:[#allocation10 + $0x28] sm:$0xff]  }
 0x621   : > { %v1305_v18 = vpop.f32.mrb[24].mxu1 }
 0x622   : > { %v1306_v19 = vadd.f32 %v1305_v18, %v3071_v40  ;;  %v2167_v20 = vpop.f32.mrb[25].mxu1 }
 0x623   : > { %v1308_v21 = vpop.f32.mrb[26].mxu1 }
 0x624   : > { %v1309_v22 = vadd.f32 %v1308_v21, %v3075_v42  ;;  %v2168_v23 = vpop.f32.mrb[27].mxu1  ;;  %2382 = vtanh.f32 %v1306_v19  ;;  %v2017_v42 = vld [vmem:[%s3320_s5 + $0x4] sm:$0x1] }
 0x626   : > { %2384 = vtanh.f32 %v1309_v22 }
 0x629   : > { %v1440_v24 = vpop.f32.mrb[28].mxu1 }
 0x62a   : > { %v1441_v56 = vadd.f32 %v1440_v24, %v3081_v45  ;;  %v2179_v25 = vpop.f32.mrb[29].mxu1 }
 0x62b   : > { %v1443_v26 = vpop.f32.mrb[30].mxu1 }
 0x62c   : > { %v1444_v27 = vadd.f32 %v1443_v26, %v3079_v44  ;;  %v2180_v28 = vpop.f32.mrb[31].mxu1  ;;  %2386 = vtanh.f32 %v1441_v56  ;;  %v1172_v26 = vsub.f32 0.0, %v3156_v4 }
 0x62d   : > { %v977_v28 = vsub.f32 0.0, %v3131_v30 }
 0x62e   : > { %2388 = vtanh.f32 %v1444_v27  ;;  %v2383_v29 = vpop.eup %2382 }
 0x630   : > { %v2385_v31 = vpop.eup %2384 }
 0x631   : > { %v1314_v40 = vpack.c.bf16 %v2385_v31, %v2383_v29 }
 0x633   : > { %2170 = vmatpush3.bf16.msra.mxu0 %v1314_v40  ;;  %v1173_v40 = vmul.f32 1.442695, %v1172_v26 }
 0x634   : > { %2181 = vmatprep.subr.bf16.mxu0 %v2669_v1 }
 0x636   : > { %2172 = vmatmul.mubr.msk.bf16.vlgmr.msra.gmra.mrb[28].mxu0 %vm490_vm3, %v2017_v42  ;;  %v2387_v45 = vpop.eup %2386  ;;  %v978_v42 = vmul.f32 1.442695, %v977_v28 }
 0x637   : > { %2183 = vmatprep.mubr.msk.bf16.mxu0 %vm2670_vm1, %v2669_v1 }
 0x638   : > { %v2389_v44 = vpop.eup %2388 }
 0x639   : > { %v1449_v32 = vpack.c.bf16 %v2389_v44, %v2387_v45 }
 0x63b   : > { %2182 = vmatpush3.bf16.msra.mxu0 %v1449_v32 }
 0x63c   : > { %2193 = vmatprep.subr.bf16.mxu0 %v2669_v1 }
 0x63e   : > { %2184 = vmatmul.mubr.msk.bf16.vlgmr.msra.gmra.mrb[32].mxu0 %vm490_vm3, %v2343_v33  ;;  %v590_v33 = vsub.f32 0.0, %v3106_v60 }
 0x63f   : > { %2194 = vmatpush3.bf16.msra.mxu0 %v2966_v6  ;;  %2195 = vmatprep.mubr.msk.bf16.mxu0 %vm2670_vm1, %v2669_v1 }
 0x640   : > { %2205 = vmatprep.subr.bf16.mxu0 %v2669_v1 }
 0x646   : > { %2196 = vmatmul.mubr.msk.bf16.vlgmr.msra.gmra.mrb[36].mxu0 %vm425_vm2, %v2344_v34 }
 0x647   : > { %2207 = vmatprep.mubr.msk.bf16.mxu0 %vm2670_vm1, %v2669_v1 }
 0x709   : > { %v1357_v35 = vpop.f32.mrb[28].mxu0 }
 0x70a   : > { %v3182_v36 = vadd.f32 %v1357_v35, %v3097_v53  ;;  %v2173_v39 = vpop.f32.mrb[29].mxu0 }
 0x70b   : > { %v1360_v57 = vpop.f32.mrb[30].mxu0 }
 0x70c   : > { %v1374_v6 = vsub.f32 %v3159_v16, %v3182_v36  ;;  %v2174_v58 = vpop.f32.mrb[31].mxu0 }
 0x70d   : > { %v591_v58 = vmul.f32 1.442695, %v590_v33 }
 0x711   : > { %v1500_v61 = vpop.f32.mrb[32].mxu0 }
 0x712   : > { %v1501_v62 = vadd.f32 %v1500_v61, %v3085_v47  ;;  %v2185_v55 = vpop.f32.mrb[33].mxu0 }
 0x713   : > { %v1503_v63 = vpop.f32.mrb[34].mxu0 }
 0x714   : > { %v1504_v3 = vadd.f32 %v1503_v63, %v3083_v46  ;;  %v2186_v7 = vpop.f32.mrb[35].mxu0  ;;  %2390 = vtanh.f32 %v1501_v62  ;;  %v2024_v46 = vld [vmem:[%s3320_s5 + $0x5] sm:$0x1] }
 0x716   : > { %2392 = vtanh.f32 %v1504_v3 }
 0x719   : > { %v1635_v9 = vpop.f32.mrb[36].mxu0 }
 0x71a   : > { %v1636_v53 = vadd.f32 %v1635_v9, %v3087_v48  ;;  %v2197_v8 = vpop.f32.mrb[37].mxu0 }
 0x71b   : > { %v1638_v10 = vpop.f32.mrb[38].mxu0 }
 0x71c   : > { %v1639_v41 = vadd.f32 %v1638_v10, %v3089_v49  ;;  %v2198_v37 = vpop.f32.mrb[39].mxu0  ;;  %2394 = vtanh.f32 %v1636_v53 }
 0x71e   : > { %2396 = vtanh.f32 %v1639_v41  ;;  %v2391_v38 = vpop.eup %2390 }
 0x720   : > { %v2393_v43 = vpop.eup %2392 }
 0x721   : > { %v1509_v47 = vpack.c.bf16 %v2393_v43, %v2391_v38 }
 0x723   : > { %2188 = vmatpush3.bf16.msra.mxu1 %v1509_v47 }
 0x724   : > { %2199 = vmatprep.subr.bf16.mxu1 %v2669_v1 }
 0x726   : > { %2190 = vmatmul.mubr.msk.bf16.vlgmr.msra.gmra.mrb[32].mxu1 %vm490_vm3, %v2024_v46  ;;  %v2395_v48 = vpop.eup %2394 }
 0x727   : > { %2201 = vmatprep.mubr.msk.bf16.mxu1 %vm2670_vm1, %v2669_v1 }
 0x728   : > { %v2397_v49 = vpop.eup %2396 }
 0x729   : > { %v1644_v11 = vpack.c.bf16 %v2397_v49, %v2395_v48 }
 0x72b   : > { %2200 = vmatpush3.bf16.msra.mxu1 %v1644_v11 }
 0x72e   : > { %2202 = vmatmul.mubr.msk.bf16.vlgmr.msra.gmra.mrb[36].mxu1 %vm490_vm3, %v2345_v12 }
 0x7f9   : > { %v1552_v5 = vpop.f32.mrb[32].mxu1 }
 0x7fa   : > { %v3199_v13 = vadd.f32 %v1552_v5, %v3093_v51  ;;  %v2191_v14 = vpop.f32.mrb[33].mxu1  ;;  %v2031_v51 = vld [vmem:[%s3320_s5 + $0x6] sm:$0x1] }
 0x7fb   : > { %v1555_v15 = vpop.f32.mrb[34].mxu1 }
 0x7fc   : > { %v1569_v16 = vsub.f32 %v1374_v6, %v3199_v13  ;;  %v2192_v17 = vpop.f32.mrb[35].mxu1  ;;  %v1562_v25 = vsub.f32 0.0, %v3199_v13 }
 0x7fe   : > { %v1563_v29 = vmul.f32 1.442695, %v1562_v25 }
 0x801   : > { %v1695_v18 = vpop.f32.mrb[36].mxu1 }
 0x802   : > { %v1696_v19 = vadd.f32 %v1695_v18, %v3091_v50  ;;  %v2203_v20 = vpop.f32.mrb[37].mxu1  ;;  %v782_v50 = vsub.f32 0.0, %v3110_v2 }
 0x803   : > { %v1698_v1 = vpop.f32.mrb[38].mxu1 }
 0x804   : > { %v1699_v21 = vadd.f32 %v1698_v1, %v3095_v52  ;;  %v2204_v22 = vpop.f32.mrb[39].mxu1  ;;  %2398 = vtanh.f32 %v1696_v19  ;;  %v1367_v52 = vsub.f32 0.0, %v3182_v36  ;;  %v783_v27 = vmul.f32 1.442695, %v782_v50 }
 0x806   : > { %2400 = vtanh.f32 %v1699_v21  ;;  %v1368_v31 = vmul.f32 1.442695, %v1367_v52 }
 0x807   : > { %2402 = vpow2.f32 %v783_v27 }
 0x808   : > { %2404 = vpow2.f32 %v1563_v29 }
 0x809   : > { %2406 = vpow2.f32 %v1368_v31 }
 0x80a   : > { %2408 = vpow2.f32 %v1173_v40 }
 0x80b   : > { %2410 = vpow2.f32 %v978_v42 }
 0x80e   : > { %v2399_v23 = vpop.eup %2398 }
 0x810   : > { %v2401_v24 = vpop.eup %2400 }
 0x811   : > { %v1704_v56 = vpack.c.bf16 %v2401_v24, %v2399_v23 }
 0x813   : > { %2206 = vmatpush3.bf16.msra.mxu0 %v1704_v56 }
 0x816   : > { %2208 = vmatmul.mubr.msk.bf16.vlgmr.msra.gmra.mrb[40].mxu0 %vm490_vm3, %v2031_v51 }
 0x8e9   : > { %v1747_v45 = vpop.f32.mrb[40].mxu0 }
 0x8ea   : > { %v3216_v44 = vadd.f32 %v1747_v45, %v3099_v54  ;;  %v2209_v32 = vpop.f32.mrb[41].mxu0  ;;  %v399_v54 = vmul.f32 1.442695, %v3103_v59 }
 0x8eb   : > { %v1750_v34 = vpop.f32.mrb[42].mxu0 }
 0x8ec   : > { %v1757_v35 = vsub.f32 0.0, %v3216_v44  ;;  %v1764_v39 = vsub.f32 %v1569_v16, %v3216_v44  ;;  %v2210_v57 = vpop.f32.mrb[43].mxu0 }
 0x8ee   : > { %v1758_v6 = vmul.f32 1.442695, %v1757_v35  ;;  %1803 = vst [vmem:[%s388_s15 - $0x1] sm:$0x2] %v1764_v39 }
 0x8ef   : > { %2561 = shalt.err (!%p2558_p8)
}
 0x8f0   : > { %s2562_s14 = scalar_lea.hbm %s3224_s10, 16  ;;  %s2566_s12 = scalar_lea.hbm %s3323_s8, 32 }
 0x8f1   : > { %p2563_p1 = scmp.ne.s32.totalorder %s3224_s10, %s2562_s14  ;;  %p2567_p2 = scmp.lt.u32.totalorder %s3224_s10, %s3323_s8 }
 0x8f2   : > { %p2568_p5 = scmp.lt.u32.totalorder %s2566_s12, %s2562_s14  ;;  %p2570_p6 = scmp.lt.u32.totalorder %s2562_s14, %s3224_s10 }
 0x8f3   : > { %p2564_p11 = pnand %p2563_p1, %p3349_p13 }
 0x8f4   : > { %p2569_p12 = por %p2568_p5, %p2567_p2 }
 0x8f5   : > { %p2565_p0 = pneg %p2564_p11 }
 0x8f6   : > { %p2571_p7 = por %p2570_p6, %p2569_p12 }
 0x8f8   : > { %p2572_p3 = pnand %p2571_p7, %p2565_p0 }
 0x8fa   : > { %2575 = shalt.err (!%p2572_p3)
}
 0x8fb   : > { %2230 = dma.vmem_to_hbm [thread:$0]  (%p3349_p13), %s3226_s18, 16, %s3224_s10, %s1810_s16   ;;  %2412 = vpow2.f32 %v1758_v6  ;;  %v2403_v59 = vpop.eup %2402  ;;  %v1559_v55 = vrot.slane %v3199_v13, 2  ;;  %v1169_v3 = vrot.slane %v3156_v4, 4  ;;  %v1364_v7 = vrot.slane %v3182_v36, 3  ;;  %v2418_v14 = vld [vmem:[%s2941_s13] sm:$0xff] }
 0x8fc   : > { %s392_s22 = sld [smem:[#allocation2]]  ;;  %2414 = vpow2.f32 %v399_v54  ;;  %v2405_v61 = vpop.eup %2404  ;;  %v1754_v8 = vrot.slane %v3216_v44, 1  ;;  %v779_v10 = vrot.slane %v3110_v2, 6  ;;  %v974_v41 = vrot.slane %v3131_v30, 5  ;;  %s2039_s13 = sshll.u32 %s2741_s11, 7 }
 0x8fd   : > { %2416 = vpow2.f32 %v591_v58  ;;  %v2407_v62 = vpop.eup %2406  ;;  %v1566_v53 = vrot.slane %v2405_v61, 3  ;;  %v587_v43 = vrot.slane %v3106_v60, 7  ;;  %v1561_v46 = vsub.f32 %v2956_v0, %v1559_v55  ;;  %s382_s18 = scalar_lea.vmem [#allocation12], %s1985_s21  ;;  %s3271_s14 = scalar_lea.hbm %s3322_s7, %s2039_s13 }
 0x8fe   : > { %v2409_v63 = vpop.eup %2408  ;;  %v1371_v37 = vrot.slane %v2407_v62, 4  ;;  %v786_v4 = vrot.slane %v2403_v59, 7  ;;  %v1171_v36 = vsub.f32 %v2956_v0, %v1169_v3  ;;  %v1366_v11 = vsub.f32 %v2956_v0, %v1364_v7  ;;  %s1822_s10 = sshll.u32 %s382_s18, 4  ;;  %s1805_s11 = scalar_lea.sflag [#allocation4], %s2935_s0  ;;  %s3273_s10 = int_to_ptr.vmem [resolvable:$true] %s1822_s10 }
 0x8ff   : > { %v2411_v9 = vpop.eup %2410  ;;  %v1176_v47 = vrot.slane %v2409_v63, 5  ;;  %v1568_v12 = vmul.f32 %v1566_v53, %v1561_v46  ;;  %v1756_v2 = vsub.f32 %v2956_v0, %v1754_v8  ;;  %v781_v15 = vsub.f32 %v2418_v14, %v779_v10  ;;  %s2576_s21 = scalar_lea.vmem %s3273_s10, 128  ;;  %s2674_s15 = smov [#allocation12]  }
 0x900   : > { %v981_v49 = vrot.slane %v2411_v9, 6  ;;  %v976_v60 = vsub.f32 %v2418_v14, %v974_v41  ;;  %v1373_v16 = vmul.f32 %v1371_v37, %v1366_v11  ;;  %v589_v20 = vsub.f32 %v2418_v14, %v587_v43  ;;  %p2577_p9 = scmp.ne.s32.totalorder %s3273_s10, %s2576_s21  ;;  %s2580_s19 = sshll.u32 %s2674_s15, 4  ;;  %s2581_s19 = int_to_ptr.vmem [resolvable:$false] %s2580_s19 }
 0x901   : > { %v1178_v18 = vmul.f32 %v1176_v47, %v1171_v36  ;;  %v788_v1 = vmul.f32 %v786_v4, %v781_v15  ;;  %vm1789_vm4 = vcmask 1040384   ;;  %v1769_v22 = vrot.slane %v1568_v12, 5  ;;  %s2582_s12 = scalar_lea.vmem %s2581_s19, 256  ;;  %p2583_p8 = scmp.lt.s32.totalorder %s3273_s10, %s2581_s19 }
 0x902   : > { %v396_v38 = vstv %s392_s22  ;;  %v983_v21 = vmul.f32 %v981_v49, %v976_v60  ;;  %vm1791_vm5 = vcmask 1041408   ;;  %vm1793_vm6 = vcmask 1042432   ;;  %p2578_p4 = pnand %p2577_p9, %p3349_p13  ;;  %p2584_p1 = scmp.lt.s32.totalorder %s2582_s12, %s2576_s21 }
 0x903   : > { %v397_v30 = vsub.f32 %v2956_v0, %v396_v38  ;;  %v1772_v0 = vrot.slane %v1373_v16, 3  ;;  %v1775_v51 = vrot.slane %v1178_v18, 1  ;;  %vm1796_vm7 = vcmask 1044480  }
 0x904   : > { %v1778_v25 = vrot.slane %v983_v21, 7  ;;  %v1781_v26 = vrot.slane %v788_v1, 5  ;;  %vm1798_vm8 = vcmask 1045504   ;;  %vm1800_vm9 = vcmask 1046528   ;;  %p2579_p10 = pneg %p2578_p4  ;;  %p2585_p11 = por %p2584_p1, %p2583_p8 }
 0x905   : > { %v2413_v48 = vpop.eup %2412 }
 0x906   : > { %v1761_v5 = vrot.slane %v2413_v48, 2  ;;  %v2415_v13 = vpop.eup %2414  ;;  %p2586_p0 = pnand %p2585_p11, %p2579_p10 }
 0x907   : > { %v2417_v17 = vpop.eup %2416  ;;  %v401_v24 = vmul.f32 %v2415_v13, %v397_v30 }
 0x908   : > { %v1763_v19 = vmul.f32 %v1761_v5, %v1756_v2  ;;  %v593_v56 = vmul.f32 %v2417_v17, %v589_v20 }
 0x909   : > { %v1787_v27 = vrot.slane %v401_v24, 1 }
 0x90a   : > { %v1766_v23 = vrot.slane %v1763_v19, 7  ;;  %v1784_v29 = vrot.slane %v593_v56, 3 }
 0x90c   : > { %v1790_v50 = vsel %vm1789_vm4, %v1766_v23, %v1769_v22 }
 0x90d   : > { %v1792_v52 = vsel %vm1791_vm5, %v1790_v50, %v1772_v0 }
 0x90e   : > { %v1794_v28 = vsel %vm1793_vm6, %v1792_v52, %v1775_v51 }
 0x90f   : > { %v1795_v31 = vsel %vm429_vm0, %v1794_v28, %v1778_v25 }
 0x910   : > { %v1797_v40 = vsel %vm1796_vm7, %v1795_v31, %v1781_v26 }
 0x911   : > { %v1799_v42 = vsel %vm1798_vm8, %v1797_v40, %v1784_v29 }
 0x912   : > { %v1801_v45 = vsel %vm1800_vm9, %v1799_v42, %v1787_v27 }
 0x913   : > { %1802 = vst [vmem:[%s382_s18] sm:$0xff] %v1801_v45 }
 0x914   : > { %2589 = shalt.err (!%p2586_p0)
}
 0x915   : > { %s2590_s0 = scalar_lea.hbm %s3271_s14, 128  ;;  %s2594_s22 = scalar_lea.hbm %s3322_s7, 256 }
 0x916   : > { %p2591_p2 = scmp.ne.s32.totalorder %s3271_s14, %s2590_s0  ;;  %p2595_p6 = scmp.lt.u32.totalorder %s3271_s14, %s3322_s7 }
 0x917   : > { %p2596_p7 = scmp.lt.u32.totalorder %s2594_s22, %s2590_s0  ;;  %p2598_p9 = scmp.lt.u32.totalorder %s2590_s0, %s3271_s14 }
 0x918   : > { %p2592_p5 = pnand %p2591_p2, %p3349_p13 }
 0x919   : > { %p2597_p3 = por %p2596_p7, %p2595_p6 }
 0x91a   : > { %p2593_p12 = pneg %p2592_p5 }
 0x91b   : > { %p2599_p4 = por %p2598_p9, %p2597_p3 }
 0x91d   : > { %p2600_p10 = pnand %p2599_p4, %p2593_p12 }
 0x91f   : > { %2603 = shalt.err (!%p2600_p10)
}
 0x920   : > { %2229 = dma.vmem_to_hbm [thread:$0]  (%p3349_p13), %s3273_s10, 128, %s3271_s14, %s1805_s11  }
 0x921 PF: > { %s1847_s16 = sand.u32 1, %s2646_s27   ;;  %p3350_p8 = scmp.ne.s32.totalorder %s3340_s17, 0 }
 0x922   : > { %p3351_p1 = scmp.ge.s32.totalorder %s2658_s30, 2  ;;  %s1848_s26 = scalar_lea.sflag [#allocation4], %s1847_s16 }
 0x924   : > { %p2251_p11 = pnand %p3351_p1, %p3350_p8 }
 0x926   : > { %2637 = dma.done.wait (!%p2251_p11), %s1848_s26, 128  }
 0x927   : > { %2639 = vsyncadd (!%p2251_p11), %s1848_s26, 4294967168  ;;  %s1857_s21 = scalar_lea.sflag [#allocation14], %s1847_s16 }
 0x928   : > { %2641 = dma.done.wait (!%p2251_p11), %s1857_s21, 16  }
 0x929   : > { %2643 = vsyncadd (!%p2251_p11), %s1857_s21, 4294967280  ;;  %p28_p13 = scmp.ge.s32.totalorder %s2855_s24, 4   ;;  %s3352_s27 = smov %s2650_s28 }
 0x92a   : > { %s3353_s28 = smov %s2654_s29  ;;  %s3354_s29 = smov %s2866_s23 }
 0x92b   : > { %s3355_s30 = smov %s2855_s24  ;;  %30 = sbr.rel (!%p28_p13) target bundleno = 12 (0xc), region = 157 }
 0x932   :  { %1861 = vsyncpa [#allocation3], 1 }
 0x933   :  { %1863 = vsyncpa [#allocation3 + $0x1], 1 }
 0x934   :  { %1864 = vsyncpa [#allocation8], 1 }
 0x935   :  { %1865 = vsyncpa [#allocation11], 1 }
 0x936   :  { %1866 = vsyncpa [#allocation4], 1 }
 0x937   :  { %1868 = vsyncpa [#allocation4 + $0x1], 1 }
 0x938   :  { %1869 = vsyncpa [#allocation14], 1 }
 0x939   :  { %1871 = vsyncpa [#allocation14 + $0x1], 1 }
 0x93a   :  { %1872 = vsyncpa [#allocation5], 1 }
 0x93b   :  { %1874 = vsyncpa [#allocation5 + $0x1], 1 }

</bundles_post_ra>
